<compile_context>
chip_gen: v6e
topology: v6e:2x2x1
jax: 0.10.0
libtpu: 0.0.40
codegen_flags: <defaults>
</compile_context>

<pallas_src>
import functools

import jax
import jax.numpy as jnp
from jax.experimental import pallas as pl
from jax.experimental.pallas import tpu as pltpu


def _lstm_gen_kernel(noise_ref, amp_ref, wih_ref, whh_ref, b_ref,
                     wproj_ref, bproj_ref, o_ref, h_acc_ref,
                     *, timesteps, hidden):
    """Fused scale-0 block: z = amp*n ; LSTM recurrence ; one post-loop projection."""
    T = timesteps
    H = hidden
    B = noise_ref.shape[0]

    # ---- Hoisted, time-invariant work (scale 0: y == 0, noise repeated over T) ----
    z = amp_ref[...] * noise_ref[...]                                   # [B, F]
    gates_ih = (jnp.dot(z, wih_ref[...], preferred_element_type=jnp.float32)
                + b_ref[...])                                           # [B, 4H]
    whh = whh_ref[...]                                                  # [H, 4H]

    h = jnp.zeros((B, H), jnp.float32)
    c = jnp.zeros((B, H), jnp.float32)

    # ---- Fully-unrolled recurrence (T is static -> static scratch offsets) ----
    # Only the recurrent matmul + gate math stay on the serial dependence chain.
    for t in range(T):
        gates = gates_ih + jnp.dot(h, whh, preferred_element_type=jnp.float32)
        # NOTE: with H=32 all four gate slices live inside a single 128-lane vreg
        # row (4H == 128); for configurable H keep 4H a multiple of 128 so the
        # gate boundaries stay lane-aligned.
        i_g = jax.nn.sigmoid(gates[:, 0:H])          # PyTorch gate order i, f, g, o
        f_g = jax.nn.sigmoid(gates[:, H:2 * H])
        g_g = jnp.tanh(gates[:, 2 * H:3 * H])
        o_g = jax.nn.sigmoid(gates[:, 3 * H:4 * H])
        c = f_g * c + i_g * g_g
        h = o_g * jnp.tanh(c)
        h_acc_ref[t * B:(t + 1) * B, :] = h          # stage h_t (static offsets)

    # ---- One post-loop projection + single bulk store ----
    h_all = h_acc_ref[...]                                              # [T*B, H]
    out = (jnp.dot(h_all, wproj_ref[...], preferred_element_type=jnp.float32)
           + bproj_ref[...])                                            # [T*B, F]
    # TODO(synk): at scale > 0 the block adds the residual `+ y_t` here and the
    #             ih matmul must move back over per-timestep z (y != 0, fresh noise);
    #             scale 0 (this module as constructed) has y == 0.
    o_ref[...] = out.astype(o_ref.dtype)


def lstm_block_apply(noise, amp, params, *, timesteps):
    """Run the fused scale-0 noise-inject + LSTM block on TPU via Pallas.

    noise : [B, F]   single-timestep noise (repeat=True -> time-invariant)
    amp   : [B]      per-batch noise amplitude
    returns [B, T, F]
    """
    B, F = noise.shape
    H = params["whh"].shape[0]
    T = timesteps

    noise = noise.astype(jnp.float32)
    amp2 = amp.reshape(B, 1).astype(jnp.float32)

    kernel = functools.partial(_lstm_gen_kernel, timesteps=T, hidden=H)

    out2d = pl.pallas_call(
        kernel,
        out_shape=jax.ShapeDtypeStruct((T * B, F), jnp.float32),
        grid=(1,),
        in_specs=[
            pl.BlockSpec((B, F), lambda i: (0, 0)),          # noise  [B, F]
            pl.BlockSpec((B, 1), lambda i: (0, 0)),          # amp    [B, 1]
            pl.BlockSpec((F, 4 * H), lambda i: (0, 0)),      # W_ih^T
            pl.BlockSpec((H, 4 * H), lambda i: (0, 0)),      # W_hh^T
            pl.BlockSpec((1, 4 * H), lambda i: (0, 0)),      # bias (b_ih + b_hh)
            pl.BlockSpec((H, F), lambda i: (0, 0)),          # W_proj^T
            pl.BlockSpec((1, F), lambda i: (0, 0)),          # b_proj
        ],
        out_specs=pl.BlockSpec((T * B, F), lambda i: (0, 0)),
        scratch_shapes=[pltpu.VMEM((T * B, H), jnp.float32)],
        compiler_params=pltpu.CompilerParams(
            dimension_semantics=("arbitrary",)),
    )(noise, amp2, params["wih"], params["whh"], params["bias"],
      params["wproj"], params["bproj"])

    # rows are (t*B + b); tiny metadata reshape + transpose back to [B, T, F].
    return out2d.reshape(T, B, F).transpose(1, 0, 2)


def init_block_params(key, features, hidden):
    """Deterministic synthetic parameters for the LSTM block (PyTorch LSTM shapes)."""
    k1, k2, k3, k4, k5, k6 = jax.random.split(key, 6)
    scale = 0.1
    wih = scale * jax.random.normal(k1, (features, 4 * hidden), jnp.float32)   # W_ih^T
    whh = scale * jax.random.normal(k2, (hidden, 4 * hidden), jnp.float32)     # W_hh^T
    b_ih = scale * jax.random.normal(k3, (4 * hidden,), jnp.float32)
    b_hh = scale * jax.random.normal(k4, (4 * hidden,), jnp.float32)
    wproj = scale * jax.random.normal(k5, (hidden, features), jnp.float32)     # Linear(H->F)^T
    bproj = scale * jax.random.normal(k6, (features,), jnp.float32)
    return {
        "wih": wih,
        "whh": whh,
        "bias": (b_ih + b_hh).reshape(1, 4 * hidden),
        "wproj": wproj,
        "bproj": bproj.reshape(1, features),
    }


def multi_lstm_generator_forward(reals, amps, params, noise_key):
    """Forward pass of MultiLSTMGenerator at scale 0 (fresh module, noises=None)."""
    key0 = "s0"
    x0 = reals[key0]                      # [B, T, F]
    B, T, F = x0.shape

    # _compute_previous: self.prev has no children at scale 0 -> y = zeros.
    # y is never materialized; its contribution (z = y + ..., residual + y) is zero
    # and is folded away inside the kernel.
    #
    # _generate_noise(reals['s0'], repeat=True): randn([B, 1, F]); the repeat across
    # timesteps is implicit in the kernel (z_t is time-invariant), so no [B, T, F]
    # broadcast is materialized in HBM.
    n_single = jax.random.normal(noise_key, (B, F), jnp.float32)

    return lstm_block_apply(n_single, amps[key0], params, timesteps=T)


if __name__ == "__main__":
    B, T, F, H = 2, 16, 8, 32

    root = jax.random.PRNGKey(0)
    k_real, k_amp, k_param, k_noise = jax.random.split(root, 4)

    reals = {"s0": jax.random.normal(k_real, (B, T, F), jnp.float32)}
    amps = {"s0": jnp.abs(jax.random.normal(k_amp, (B,), jnp.float32)) + 0.5}
    params = init_block_params(k_param, F, H)

    out = multi_lstm_generator_forward(reals, amps, params, k_noise)
    out = jax.block_until_ready(out)

    assert out.shape == (B, T, F), out.shape
    assert jnp.all(jnp.isfinite(out))
    print("KERNEL_OK")
</pallas_src>

<mosaic_0001>
module attributes {stable_mosaic.version = 11 : i64} {
  func.func @_lstm_gen_kernel(%arg0: i32, %arg1: memref<2x8xf32, #tpu.memory_space<vmem>>, %arg2: memref<2x1xf32, #tpu.memory_space<vmem>>, %arg3: memref<8x128xf32, #tpu.memory_space<vmem>>, %arg4: memref<32x128xf32, #tpu.memory_space<vmem>>, %arg5: memref<1x128xf32, #tpu.memory_space<vmem>>, %arg6: memref<32x8xf32, #tpu.memory_space<vmem>>, %arg7: memref<1x8xf32, #tpu.memory_space<vmem>>, %arg8: memref<32x8xf32, #tpu.memory_space<vmem>>, %arg9: memref<32x32xf32, #tpu.memory_space<vmem>>) attributes {dimension_semantics = [#tpu.dimension_semantics<arbitrary>], iteration_bounds = array<i64: 1>, scalar_prefetch = 0 : i64, scratch_operands = 1 : i64, tpu.core_type = #tpu.core_type<tc>, window_params = [{pipeline_mode = #tpu.pipeline_mode<synchronous>, transform_indices = @transform_0, window_bounds = array<i64: 2, 8>}, {pipeline_mode = #tpu.pipeline_mode<synchronous>, transform_indices = @transform_1, window_bounds = array<i64: 2, 1>}, {pipeline_mode = #tpu.pipeline_mode<synchronous>, transform_indices = @transform_2, window_bounds = array<i64: 8, 128>}, {pipeline_mode = #tpu.pipeline_mode<synchronous>, transform_indices = @transform_3, window_bounds = array<i64: 32, 128>}, {pipeline_mode = #tpu.pipeline_mode<synchronous>, transform_indices = @transform_4, window_bounds = array<i64: 1, 128>}, {pipeline_mode = #tpu.pipeline_mode<synchronous>, transform_indices = @transform_5, window_bounds = array<i64: 32, 8>}, {pipeline_mode = #tpu.pipeline_mode<synchronous>, transform_indices = @transform_6, window_bounds = array<i64: 1, 8>}, {pipeline_mode = #tpu.pipeline_mode<synchronous>, transform_indices = @transform_7, window_bounds = array<i64: 32, 8>}]} {
    %c0 = arith.constant 0 : index
    %c0_0 = arith.constant 0 : index
    %0 = vector.load %arg2[%c0, %c0_0] : memref<2x1xf32, #tpu.memory_space<vmem>>, vector<2x1xf32>
    %c0_1 = arith.constant 0 : index
    %c0_2 = arith.constant 0 : index
    %1 = vector.load %arg1[%c0_1, %c0_2] : memref<2x8xf32, #tpu.memory_space<vmem>>, vector<2x8xf32>
    %2 = vector.broadcast %0 : vector<2x1xf32> to vector<2x8xf32>
    %3 = arith.mulf %2, %1 : vector<2x8xf32>
    %c0_3 = arith.constant 0 : index
    %c0_4 = arith.constant 0 : index
    %4 = vector.load %arg3[%c0_3, %c0_4] : memref<8x128xf32, #tpu.memory_space<vmem>>, vector<8x128xf32>
    %cst = arith.constant dense<0.000000e+00> : vector<2x128xf32>
    %5 = tpu.matmul %3, %4, %cst {dimension_numbers = #tpu.dot_dimension_numbers<[1], [0], [0], [1], [0, 0, 1, 1], [], []>} : vector<2x8xf32>, vector<8x128xf32>, vector<2x128xf32> -> vector<2x128xf32>
    %c0_5 = arith.constant 0 : index
    %c0_6 = arith.constant 0 : index
    %6 = vector.load %arg5[%c0_5, %c0_6] : memref<1x128xf32, #tpu.memory_space<vmem>>, vector<1x128xf32>
    %7 = vector.broadcast %6 : vector<1x128xf32> to vector<2x128xf32>
    %8 = arith.addf %5, %7 : vector<2x128xf32>
    %c0_7 = arith.constant 0 : index
    %c0_8 = arith.constant 0 : index
    %9 = vector.load %arg4[%c0_7, %c0_8] : memref<32x128xf32, #tpu.memory_space<vmem>>, vector<32x128xf32>
    %cst_9 = arith.constant 0.000000e+00 : f32
    %10 = vector.broadcast %cst_9 : f32 to vector<2x32xf32>
    %cst_10 = arith.constant 0.000000e+00 : f32
    %11 = vector.broadcast %cst_10 : f32 to vector<2x32xf32>
    %cst_11 = arith.constant dense<0.000000e+00> : vector<2x128xf32>
    %12 = tpu.matmul %10, %9, %cst_11 {dimension_numbers = #tpu.dot_dimension_numbers<[1], [0], [0], [1], [0, 0, 1, 1], [], []>} : vector<2x32xf32>, vector<32x128xf32>, vector<2x128xf32> -> vector<2x128xf32>
    %13 = arith.addf %8, %12 : vector<2x128xf32>
    %14 = vector.extract_strided_slice %13 {offsets = [0, 0], sizes = [2, 32], strides = [1, 1]} : vector<2x128xf32> to vector<2x32xf32>
    %15 = arith.negf %14 : vector<2x32xf32>
    %16 = math.exp %15 : vector<2x32xf32>
    %cst_12 = arith.constant 1.000000e+00 : f32
    %17 = vector.broadcast %cst_12 : f32 to vector<2x32xf32>
    %18 = arith.addf %17, %16 : vector<2x32xf32>
    %19 = arith.divf %17, %18 : vector<2x32xf32>
    %20 = vector.extract_strided_slice %13 {offsets = [0, 32], sizes = [2, 32], strides = [1, 1]} : vector<2x128xf32> to vector<2x32xf32>
    %21 = arith.negf %20 : vector<2x32xf32>
    %22 = math.exp %21 : vector<2x32xf32>
    %cst_13 = arith.constant 1.000000e+00 : f32
    %23 = vector.broadcast %cst_13 : f32 to vector<2x32xf32>
    %24 = arith.addf %23, %22 : vector<2x32xf32>
    %25 = arith.divf %23, %24 : vector<2x32xf32>
    %26 = vector.extract_strided_slice %13 {offsets = [0, 64], sizes = [2, 32], strides = [1, 1]} : vector<2x128xf32> to vector<2x32xf32>
    %27 = math.tanh %26 : vector<2x32xf32>
    %28 = vector.extract_strided_slice %13 {offsets = [0, 96], sizes = [2, 32], strides = [1, 1]} : vector<2x128xf32> to vector<2x32xf32>
    %29 = arith.negf %28 : vector<2x32xf32>
    %30 = math.exp %29 : vector<2x32xf32>
    %cst_14 = arith.constant 1.000000e+00 : f32
    %31 = vector.broadcast %cst_14 : f32 to vector<2x32xf32>
    %32 = arith.addf %31, %30 : vector<2x32xf32>
    %33 = arith.divf %31, %32 : vector<2x32xf32>
    %34 = arith.mulf %25, %11 : vector<2x32xf32>
    %35 = arith.mulf %19, %27 : vector<2x32xf32>
    %36 = arith.addf %34, %35 : vector<2x32xf32>
    %37 = math.tanh %36 : vector<2x32xf32>
    %38 = arith.mulf %33, %37 : vector<2x32xf32>
    %c0_15 = arith.constant 0 : index
    %c0_16 = arith.constant 0 : index
    %39 = vector.load %arg9[%c0_15, %c0_16] : memref<32x32xf32, #tpu.memory_space<vmem>>, vector<2x32xf32>
    tpu.vector_store %arg9[%c0_15, %c0_16], %38 {strides = array<i32>} : memref<32x32xf32, #tpu.memory_space<vmem>>, vector<2x32xf32>,
    %cst_17 = arith.constant dense<0.000000e+00> : vector<2x128xf32>
    %40 = tpu.matmul %38, %9, %cst_17 {dimension_numbers = #tpu.dot_dimension_numbers<[1], [0], [0], [1], [0, 0, 1, 1], [], []>} : vector<2x32xf32>, vector<32x128xf32>, vector<2x128xf32> -> vector<2x128xf32>
    %41 = arith.addf %8, %40 : vector<2x128xf32>
    %42 = vector.extract_strided_slice %41 {offsets = [0, 0], sizes = [2, 32], strides = [1, 1]} : vector<2x128xf32> to vector<2x32xf32>
    %43 = arith.negf %42 : vector<2x32xf32>
    %44 = math.exp %43 : vector<2x32xf32>
    %cst_18 = arith.constant 1.000000e+00 : f32
    %45 = vector.broadcast %cst_18 : f32 to vector<2x32xf32>
    %46 = arith.addf %45, %44 : vector<2x32xf32>
    %47 = arith.divf %45, %46 : vector<2x32xf32>
    %48 = vector.extract_strided_slice %41 {offsets = [0, 32], sizes = [2, 32], strides = [1, 1]} : vector<2x128xf32> to vector<2x32xf32>
    %49 = arith.negf %48 : vector<2x32xf32>
    %50 = math.exp %49 : vector<2x32xf32>
    %cst_19 = arith.constant 1.000000e+00 : f32
    %51 = vector.broadcast %cst_19 : f32 to vector<2x32xf32>
    %52 = arith.addf %51, %50 : vector<2x32xf32>
    %53 = arith.divf %51, %52 : vector<2x32xf32>
    %54 = vector.extract_strided_slice %41 {offsets = [0, 64], sizes = [2, 32], strides = [1, 1]} : vector<2x128xf32> to vector<2x32xf32>
    %55 = math.tanh %54 : vector<2x32xf32>
    %56 = vector.extract_strided_slice %41 {offsets = [0, 96], sizes = [2, 32], strides = [1, 1]} : vector<2x128xf32> to vector<2x32xf32>
    %57 = arith.negf %56 : vector<2x32xf32>
    %58 = math.exp %57 : vector<2x32xf32>
    %cst_20 = arith.constant 1.000000e+00 : f32
    %59 = vector.broadcast %cst_20 : f32 to vector<2x32xf32>
    %60 = arith.addf %59, %58 : vector<2x32xf32>
    %61 = arith.divf %59, %60 : vector<2x32xf32>
    %62 = arith.mulf %53, %36 : vector<2x32xf32>
    %63 = arith.mulf %47, %55 : vector<2x32xf32>
    %64 = arith.addf %62, %63 : vector<2x32xf32>
    %65 = math.tanh %64 : vector<2x32xf32>
    %66 = arith.mulf %61, %65 : vector<2x32xf32>
    %c2 = arith.constant 2 : index
    %c0_21 = arith.constant 0 : index
    %67 = vector.load %arg9[%c2, %c0_21] : memref<32x32xf32, #tpu.memory_space<vmem>>, vector<2x32xf32>
    tpu.vector_store %arg9[%c2, %c0_21], %66 {strides = array<i32>} : memref<32x32xf32, #tpu.memory_space<vmem>>, vector<2x32xf32>,
    %cst_22 = arith.constant dense<0.000000e+00> : vector<2x128xf32>
    %68 = tpu.matmul %66, %9, %cst_22 {dimension_numbers = #tpu.dot_dimension_numbers<[1], [0], [0], [1], [0, 0, 1, 1], [], []>} : vector<2x32xf32>, vector<32x128xf32>, vector<2x128xf32> -> vector<2x128xf32>
    %69 = arith.addf %8, %68 : vector<2x128xf32>
    %70 = vector.extract_strided_slice %69 {offsets = [0, 0], sizes = [2, 32], strides = [1, 1]} : vector<2x128xf32> to vector<2x32xf32>
    %71 = arith.negf %70 : vector<2x32xf32>
    %72 = math.exp %71 : vector<2x32xf32>
    %cst_23 = arith.constant 1.000000e+00 : f32
    %73 = vector.broadcast %cst_23 : f32 to vector<2x32xf32>
    %74 = arith.addf %73, %72 : vector<2x32xf32>
    %75 = arith.divf %73, %74 : vector<2x32xf32>
    %76 = vector.extract_strided_slice %69 {offsets = [0, 32], sizes = [2, 32], strides = [1, 1]} : vector<2x128xf32> to vector<2x32xf32>
    %77 = arith.negf %76 : vector<2x32xf32>
    %78 = math.exp %77 : vector<2x32xf32>
    %cst_24 = arith.constant 1.000000e+00 : f32
    %79 = vector.broadcast %cst_24 : f32 to vector<2x32xf32>
    %80 = arith.addf %79, %78 : vector<2x32xf32>
    %81 = arith.divf %79, %80 : vector<2x32xf32>
    %82 = vector.extract_strided_slice %69 {offsets = [0, 64], sizes = [2, 32], strides = [1, 1]} : vector<2x128xf32> to vector<2x32xf32>
    %83 = math.tanh %82 : vector<2x32xf32>
    %84 = vector.extract_strided_slice %69 {offsets = [0, 96], sizes = [2, 32], strides = [1, 1]} : vector<2x128xf32> to vector<2x32xf32>
    %85 = arith.negf %84 : vector<2x32xf32>
    %86 = math.exp %85 : vector<2x32xf32>
    %cst_25 = arith.constant 1.000000e+00 : f32
    %87 = vector.broadcast %cst_25 : f32 to vector<2x32xf32>
    %88 = arith.addf %87, %86 : vector<2x32xf32>
    %89 = arith.divf %87, %88 : vector<2x32xf32>
    %90 = arith.mulf %81, %64 : vector<2x32xf32>
    %91 = arith.mulf %75, %83 : vector<2x32xf32>
    %92 = arith.addf %90, %91 : vector<2x32xf32>
    %93 = math.tanh %92 : vector<2x32xf32>
    %94 = arith.mulf %89, %93 : vector<2x32xf32>
    %c4 = arith.constant 4 : index
    %c0_26 = arith.constant 0 : index
    %95 = vector.load %arg9[%c4, %c0_26] : memref<32x32xf32, #tpu.memory_space<vmem>>, vector<2x32xf32>
    tpu.vector_store %arg9[%c4, %c0_26], %94 {strides = array<i32>} : memref<32x32xf32, #tpu.memory_space<vmem>>, vector<2x32xf32>,
    %cst_27 = arith.constant dense<0.000000e+00> : vector<2x128xf32>
    %96 = tpu.matmul %94, %9, %cst_27 {dimension_numbers = #tpu.dot_dimension_numbers<[1], [0], [0], [1], [0, 0, 1, 1], [], []>} : vector<2x32xf32>, vector<32x128xf32>, vector<2x128xf32> -> vector<2x128xf32>
    %97 = arith.addf %8, %96 : vector<2x128xf32>
    %98 = vector.extract_strided_slice %97 {offsets = [0, 0], sizes = [2, 32], strides = [1, 1]} : vector<2x128xf32> to vector<2x32xf32>
    %99 = arith.negf %98 : vector<2x32xf32>
    %100 = math.exp %99 : vector<2x32xf32>
    %cst_28 = arith.constant 1.000000e+00 : f32
    %101 = vector.broadcast %cst_28 : f32 to vector<2x32xf32>
    %102 = arith.addf %101, %100 : vector<2x32xf32>
    %103 = arith.divf %101, %102 : vector<2x32xf32>
    %104 = vector.extract_strided_slice %97 {offsets = [0, 32], sizes = [2, 32], strides = [1, 1]} : vector<2x128xf32> to vector<2x32xf32>
    %105 = arith.negf %104 : vector<2x32xf32>
    %106 = math.exp %105 : vector<2x32xf32>
    %cst_29 = arith.constant 1.000000e+00 : f32
    %107 = vector.broadcast %cst_29 : f32 to vector<2x32xf32>
    %108 = arith.addf %107, %106 : vector<2x32xf32>
    %109 = arith.divf %107, %108 : vector<2x32xf32>
    %110 = vector.extract_strided_slice %97 {offsets = [0, 64], sizes = [2, 32], strides = [1, 1]} : vector<2x128xf32> to vector<2x32xf32>
    %111 = math.tanh %110 : vector<2x32xf32>
    %112 = vector.extract_strided_slice %97 {offsets = [0, 96], sizes = [2, 32], strides = [1, 1]} : vector<2x128xf32> to vector<2x32xf32>
    %113 = arith.negf %112 : vector<2x32xf32>
    %114 = math.exp %113 : vector<2x32xf32>
    %cst_30 = arith.constant 1.000000e+00 : f32
    %115 = vector.broadcast %cst_30 : f32 to vector<2x32xf32>
    %116 = arith.addf %115, %114 : vector<2x32xf32>
    %117 = arith.divf %115, %116 : vector<2x32xf32>
    %118 = arith.mulf %109, %92 : vector<2x32xf32>
    %119 = arith.mulf %103, %111 : vector<2x32xf32>
    %120 = arith.addf %118, %119 : vector<2x32xf32>
    %121 = math.tanh %120 : vector<2x32xf32>
    %122 = arith.mulf %117, %121 : vector<2x32xf32>
    %c6 = arith.constant 6 : index
    %c0_31 = arith.constant 0 : index
    %123 = vector.load %arg9[%c6, %c0_31] : memref<32x32xf32, #tpu.memory_space<vmem>>, vector<2x32xf32>
    tpu.vector_store %arg9[%c6, %c0_31], %122 {strides = array<i32>} : memref<32x32xf32, #tpu.memory_space<vmem>>, vector<2x32xf32>,
    %cst_32 = arith.constant dense<0.000000e+00> : vector<2x128xf32>
    %124 = tpu.matmul %122, %9, %cst_32 {dimension_numbers = #tpu.dot_dimension_numbers<[1], [0], [0], [1], [0, 0, 1, 1], [], []>} : vector<2x32xf32>, vector<32x128xf32>, vector<2x128xf32> -> vector<2x128xf32>
    %125 = arith.addf %8, %124 : vector<2x128xf32>
    %126 = vector.extract_strided_slice %125 {offsets = [0, 0], sizes = [2, 32], strides = [1, 1]} : vector<2x128xf32> to vector<2x32xf32>
    %127 = arith.negf %126 : vector<2x32xf32>
    %128 = math.exp %127 : vector<2x32xf32>
    %cst_33 = arith.constant 1.000000e+00 : f32
    %129 = vector.broadcast %cst_33 : f32 to vector<2x32xf32>
    %130 = arith.addf %129, %128 : vector<2x32xf32>
    %131 = arith.divf %129, %130 : vector<2x32xf32>
    %132 = vector.extract_strided_slice %125 {offsets = [0, 32], sizes = [2, 32], strides = [1, 1]} : vector<2x128xf32> to vector<2x32xf32>
    %133 = arith.negf %132 : vector<2x32xf32>
    %134 = math.exp %133 : vector<2x32xf32>
    %cst_34 = arith.constant 1.000000e+00 : f32
    %135 = vector.broadcast %cst_34 : f32 to vector<2x32xf32>
    %136 = arith.addf %135, %134 : vector<2x32xf32>
    %137 = arith.divf %135, %136 : vector<2x32xf32>
    %138 = vector.extract_strided_slice %125 {offsets = [0, 64], sizes = [2, 32], strides = [1, 1]} : vector<2x128xf32> to vector<2x32xf32>
    %139 = math.tanh %138 : vector<2x32xf32>
    %140 = vector.extract_strided_slice %125 {offsets = [0, 96], sizes = [2, 32], strides = [1, 1]} : vector<2x128xf32> to vector<2x32xf32>
    %141 = arith.negf %140 : vector<2x32xf32>
    %142 = math.exp %141 : vector<2x32xf32>
    %cst_35 = arith.constant 1.000000e+00 : f32
    %143 = vector.broadcast %cst_35 : f32 to vector<2x32xf32>
    %144 = arith.addf %143, %142 : vector<2x32xf32>
    %145 = arith.divf %143, %144 : vector<2x32xf32>
    %146 = arith.mulf %137, %120 : vector<2x32xf32>
    %147 = arith.mulf %131, %139 : vector<2x32xf32>
    %148 = arith.addf %146, %147 : vector<2x32xf32>
    %149 = math.tanh %148 : vector<2x32xf32>
    %150 = arith.mulf %145, %149 : vector<2x32xf32>
    %c8 = arith.constant 8 : index
    %c0_36 = arith.constant 0 : index
    %151 = vector.load %arg9[%c8, %c0_36] : memref<32x32xf32, #tpu.memory_space<vmem>>, vector<2x32xf32>
    tpu.vector_store %arg9[%c8, %c0_36], %150 {strides = array<i32>} : memref<32x32xf32, #tpu.memory_space<vmem>>, vector<2x32xf32>,
    %cst_37 = arith.constant dense<0.000000e+00> : vector<2x128xf32>
    %152 = tpu.matmul %150, %9, %cst_37 {dimension_numbers = #tpu.dot_dimension_numbers<[1], [0], [0], [1], [0, 0, 1, 1], [], []>} : vector<2x32xf32>, vector<32x128xf32>, vector<2x128xf32> -> vector<2x128xf32>
    %153 = arith.addf %8, %152 : vector<2x128xf32>
    %154 = vector.extract_strided_slice %153 {offsets = [0, 0], sizes = [2, 32], strides = [1, 1]} : vector<2x128xf32> to vector<2x32xf32>
    %155 = arith.negf %154 : vector<2x32xf32>
    %156 = math.exp %155 : vector<2x32xf32>
    %cst_38 = arith.constant 1.000000e+00 : f32
    %157 = vector.broadcast %cst_38 : f32 to vector<2x32xf32>
    %158 = arith.addf %157, %156 : vector<2x32xf32>
    %159 = arith.divf %157, %158 : vector<2x32xf32>
    %160 = vector.extract_strided_slice %153 {offsets = [0, 32], sizes = [2, 32], strides = [1, 1]} : vector<2x128xf32> to vector<2x32xf32>
    %161 = arith.negf %160 : vector<2x32xf32>
    %162 = math.exp %161 : vector<2x32xf32>
    %cst_39 = arith.constant 1.000000e+00 : f32
    %163 = vector.broadcast %cst_39 : f32 to vector<2x32xf32>
    %164 = arith.addf %163, %162 : vector<2x32xf32>
    %165 = arith.divf %163, %164 : vector<2x32xf32>
    %166 = vector.extract_strided_slice %153 {offsets = [0, 64], sizes = [2, 32], strides = [1, 1]} : vector<2x128xf32> to vector<2x32xf32>
    %167 = math.tanh %166 : vector<2x32xf32>
    %168 = vector.extract_strided_slice %153 {offsets = [0, 96], sizes = [2, 32], strides = [1, 1]} : vector<2x128xf32> to vector<2x32xf32>
    %169 = arith.negf %168 : vector<2x32xf32>
    %170 = math.exp %169 : vector<2x32xf32>
    %cst_40 = arith.constant 1.000000e+00 : f32
    %171 = vector.broadcast %cst_40 : f32 to vector<2x32xf32>
    %172 = arith.addf %171, %170 : vector<2x32xf32>
    %173 = arith.divf %171, %172 : vector<2x32xf32>
    %174 = arith.mulf %165, %148 : vector<2x32xf32>
    %175 = arith.mulf %159, %167 : vector<2x32xf32>
    %176 = arith.addf %174, %175 : vector<2x32xf32>
    %177 = math.tanh %176 : vector<2x32xf32>
    %178 = arith.mulf %173, %177 : vector<2x32xf32>
    %c10 = arith.constant 10 : index
    %c0_41 = arith.constant 0 : index
    %179 = vector.load %arg9[%c10, %c0_41] : memref<32x32xf32, #tpu.memory_space<vmem>>, vector<2x32xf32>
    tpu.vector_store %arg9[%c10, %c0_41], %178 {strides = array<i32>} : memref<32x32xf32, #tpu.memory_space<vmem>>, vector<2x32xf32>,
    %cst_42 = arith.constant dense<0.000000e+00> : vector<2x128xf32>
    %180 = tpu.matmul %178, %9, %cst_42 {dimension_numbers = #tpu.dot_dimension_numbers<[1], [0], [0], [1], [0, 0, 1, 1], [], []>} : vector<2x32xf32>, vector<32x128xf32>, vector<2x128xf32> -> vector<2x128xf32>
    %181 = arith.addf %8, %180 : vector<2x128xf32>
    %182 = vector.extract_strided_slice %181 {offsets = [0, 0], sizes = [2, 32], strides = [1, 1]} : vector<2x128xf32> to vector<2x32xf32>
    %183 = arith.negf %182 : vector<2x32xf32>
    %184 = math.exp %183 : vector<2x32xf32>
    %cst_43 = arith.constant 1.000000e+00 : f32
    %185 = vector.broadcast %cst_43 : f32 to vector<2x32xf32>
    %186 = arith.addf %185, %184 : vector<2x32xf32>
    %187 = arith.divf %185, %186 : vector<2x32xf32>
    %188 = vector.extract_strided_slice %181 {offsets = [0, 32], sizes = [2, 32], strides = [1, 1]} : vector<2x128xf32> to vector<2x32xf32>
    %189 = arith.negf %188 : vector<2x32xf32>
    %190 = math.exp %189 : vector<2x32xf32>
    %cst_44 = arith.constant 1.000000e+00 : f32
    %191 = vector.broadcast %cst_44 : f32 to vector<2x32xf32>
    %192 = arith.addf %191, %190 : vector<2x32xf32>
    %193 = arith.divf %191, %192 : vector<2x32xf32>
    %194 = vector.extract_strided_slice %181 {offsets = [0, 64], sizes = [2, 32], strides = [1, 1]} : vector<2x128xf32> to vector<2x32xf32>
    %195 = math.tanh %194 : vector<2x32xf32>
    %196 = vector.extract_strided_slice %181 {offsets = [0, 96], sizes = [2, 32], strides = [1, 1]} : vector<2x128xf32> to vector<2x32xf32>
    %197 = arith.negf %196 : vector<2x32xf32>
    %198 = math.exp %197 : vector<2x32xf32>
    %cst_45 = arith.constant 1.000000e+00 : f32
    %199 = vector.broadcast %cst_45 : f32 to vector<2x32xf32>
    %200 = arith.addf %199, %198 : vector<2x32xf32>
    %201 = arith.divf %199, %200 : vector<2x32xf32>
    %202 = arith.mulf %193, %176 : vector<2x32xf32>
    %203 = arith.mulf %187, %195 : vector<2x32xf32>
    %204 = arith.addf %202, %203 : vector<2x32xf32>
    %205 = math.tanh %204 : vector<2x32xf32>
    %206 = arith.mulf %201, %205 : vector<2x32xf32>
    %c12 = arith.constant 12 : index
    %c0_46 = arith.constant 0 : index
    %207 = vector.load %arg9[%c12, %c0_46] : memref<32x32xf32, #tpu.memory_space<vmem>>, vector<2x32xf32>
    tpu.vector_store %arg9[%c12, %c0_46], %206 {strides = array<i32>} : memref<32x32xf32, #tpu.memory_space<vmem>>, vector<2x32xf32>,
    %cst_47 = arith.constant dense<0.000000e+00> : vector<2x128xf32>
    %208 = tpu.matmul %206, %9, %cst_47 {dimension_numbers = #tpu.dot_dimension_numbers<[1], [0], [0], [1], [0, 0, 1, 1], [], []>} : vector<2x32xf32>, vector<32x128xf32>, vector<2x128xf32> -> vector<2x128xf32>
    %209 = arith.addf %8, %208 : vector<2x128xf32>
    %210 = vector.extract_strided_slice %209 {offsets = [0, 0], sizes = [2, 32], strides = [1, 1]} : vector<2x128xf32> to vector<2x32xf32>
    %211 = arith.negf %210 : vector<2x32xf32>
    %212 = math.exp %211 : vector<2x32xf32>
    %cst_48 = arith.constant 1.000000e+00 : f32
    %213 = vector.broadcast %cst_48 : f32 to vector<2x32xf32>
    %214 = arith.addf %213, %212 : vector<2x32xf32>
    %215 = arith.divf %213, %214 : vector<2x32xf32>
    %216 = vector.extract_strided_slice %209 {offsets = [0, 32], sizes = [2, 32], strides = [1, 1]} : vector<2x128xf32> to vector<2x32xf32>
    %217 = arith.negf %216 : vector<2x32xf32>
    %218 = math.exp %217 : vector<2x32xf32>
    %cst_49 = arith.constant 1.000000e+00 : f32
    %219 = vector.broadcast %cst_49 : f32 to vector<2x32xf32>
    %220 = arith.addf %219, %218 : vector<2x32xf32>
    %221 = arith.divf %219, %220 : vector<2x32xf32>
    %222 = vector.extract_strided_slice %209 {offsets = [0, 64], sizes = [2, 32], strides = [1, 1]} : vector<2x128xf32> to vector<2x32xf32>
    %223 = math.tanh %222 : vector<2x32xf32>
    %224 = vector.extract_strided_slice %209 {offsets = [0, 96], sizes = [2, 32], strides = [1, 1]} : vector<2x128xf32> to vector<2x32xf32>
    %225 = arith.negf %224 : vector<2x32xf32>
    %226 = math.exp %225 : vector<2x32xf32>
    %cst_50 = arith.constant 1.000000e+00 : f32
    %227 = vector.broadcast %cst_50 : f32 to vector<2x32xf32>
    %228 = arith.addf %227, %226 : vector<2x32xf32>
    %229 = arith.divf %227, %228 : vector<2x32xf32>
    %230 = arith.mulf %221, %204 : vector<2x32xf32>
    %231 = arith.mulf %215, %223 : vector<2x32xf32>
    %232 = arith.addf %230, %231 : vector<2x32xf32>
    %233 = math.tanh %232 : vector<2x32xf32>
    %234 = arith.mulf %229, %233 : vector<2x32xf32>
    %c14 = arith.constant 14 : index
    %c0_51 = arith.constant 0 : index
    %235 = vector.load %arg9[%c14, %c0_51] : memref<32x32xf32, #tpu.memory_space<vmem>>, vector<2x32xf32>
    tpu.vector_store %arg9[%c14, %c0_51], %234 {strides = array<i32>} : memref<32x32xf32, #tpu.memory_space<vmem>>, vector<2x32xf32>,
    %cst_52 = arith.constant dense<0.000000e+00> : vector<2x128xf32>
    %236 = tpu.matmul %234, %9, %cst_52 {dimension_numbers = #tpu.dot_dimension_numbers<[1], [0], [0], [1], [0, 0, 1, 1], [], []>} : vector<2x32xf32>, vector<32x128xf32>, vector<2x128xf32> -> vector<2x128xf32>
    %237 = arith.addf %8, %236 : vector<2x128xf32>
    %238 = vector.extract_strided_slice %237 {offsets = [0, 0], sizes = [2, 32], strides = [1, 1]} : vector<2x128xf32> to vector<2x32xf32>
    %239 = arith.negf %238 : vector<2x32xf32>
    %240 = math.exp %239 : vector<2x32xf32>
    %cst_53 = arith.constant 1.000000e+00 : f32
    %241 = vector.broadcast %cst_53 : f32 to vector<2x32xf32>
    %242 = arith.addf %241, %240 : vector<2x32xf32>
    %243 = arith.divf %241, %242 : vector<2x32xf32>
    %244 = vector.extract_strided_slice %237 {offsets = [0, 32], sizes = [2, 32], strides = [1, 1]} : vector<2x128xf32> to vector<2x32xf32>
    %245 = arith.negf %244 : vector<2x32xf32>
    %246 = math.exp %245 : vector<2x32xf32>
    %cst_54 = arith.constant 1.000000e+00 : f32
    %247 = vector.broadcast %cst_54 : f32 to vector<2x32xf32>
    %248 = arith.addf %247, %246 : vector<2x32xf32>
    %249 = arith.divf %247, %248 : vector<2x32xf32>
    %250 = vector.extract_strided_slice %237 {offsets = [0, 64], sizes = [2, 32], strides = [1, 1]} : vector<2x128xf32> to vector<2x32xf32>
    %251 = math.tanh %250 : vector<2x32xf32>
    %252 = vector.extract_strided_slice %237 {offsets = [0, 96], sizes = [2, 32], strides = [1, 1]} : vector<2x128xf32> to vector<2x32xf32>
    %253 = arith.negf %252 : vector<2x32xf32>
    %254 = math.exp %253 : vector<2x32xf32>
    %cst_55 = arith.constant 1.000000e+00 : f32
    %255 = vector.broadcast %cst_55 : f32 to vector<2x32xf32>
    %256 = arith.addf %255, %254 : vector<2x32xf32>
    %257 = arith.divf %255, %256 : vector<2x32xf32>
    %258 = arith.mulf %249, %232 : vector<2x32xf32>
    %259 = arith.mulf %243, %251 : vector<2x32xf32>
    %260 = arith.addf %258, %259 : vector<2x32xf32>
    %261 = math.tanh %260 : vector<2x32xf32>
    %262 = arith.mulf %257, %261 : vector<2x32xf32>
    %c16 = arith.constant 16 : index
    %c0_56 = arith.constant 0 : index
    %263 = vector.load %arg9[%c16, %c0_56] : memref<32x32xf32, #tpu.memory_space<vmem>>, vector<2x32xf32>
    tpu.vector_store %arg9[%c16, %c0_56], %262 {strides = array<i32>} : memref<32x32xf32, #tpu.memory_space<vmem>>, vector<2x32xf32>,
    %cst_57 = arith.constant dense<0.000000e+00> : vector<2x128xf32>
    %264 = tpu.matmul %262, %9, %cst_57 {dimension_numbers = #tpu.dot_dimension_numbers<[1], [0], [0], [1], [0, 0, 1, 1], [], []>} : vector<2x32xf32>, vector<32x128xf32>, vector<2x128xf32> -> vector<2x128xf32>
    %265 = arith.addf %8, %264 : vector<2x128xf32>
    %266 = vector.extract_strided_slice %265 {offsets = [0, 0], sizes = [2, 32], strides = [1, 1]} : vector<2x128xf32> to vector<2x32xf32>
    %267 = arith.negf %266 : vector<2x32xf32>
    %268 = math.exp %267 : vector<2x32xf32>
    %cst_58 = arith.constant 1.000000e+00 : f32
    %269 = vector.broadcast %cst_58 : f32 to vector<2x32xf32>
    %270 = arith.addf %269, %268 : vector<2x32xf32>
    %271 = arith.divf %269, %270 : vector<2x32xf32>
    %272 = vector.extract_strided_slice %265 {offsets = [0, 32], sizes = [2, 32], strides = [1, 1]} : vector<2x128xf32> to vector<2x32xf32>
    %273 = arith.negf %272 : vector<2x32xf32>
    %274 = math.exp %273 : vector<2x32xf32>
    %cst_59 = arith.constant 1.000000e+00 : f32
    %275 = vector.broadcast %cst_59 : f32 to vector<2x32xf32>
    %276 = arith.addf %275, %274 : vector<2x32xf32>
    %277 = arith.divf %275, %276 : vector<2x32xf32>
    %278 = vector.extract_strided_slice %265 {offsets = [0, 64], sizes = [2, 32], strides = [1, 1]} : vector<2x128xf32> to vector<2x32xf32>
    %279 = math.tanh %278 : vector<2x32xf32>
    %280 = vector.extract_strided_slice %265 {offsets = [0, 96], sizes = [2, 32], strides = [1, 1]} : vector<2x128xf32> to vector<2x32xf32>
    %281 = arith.negf %280 : vector<2x32xf32>
    %282 = math.exp %281 : vector<2x32xf32>
    %cst_60 = arith.constant 1.000000e+00 : f32
    %283 = vector.broadcast %cst_60 : f32 to vector<2x32xf32>
    %284 = arith.addf %283, %282 : vector<2x32xf32>
    %285 = arith.divf %283, %284 : vector<2x32xf32>
    %286 = arith.mulf %277, %260 : vector<2x32xf32>
    %287 = arith.mulf %271, %279 : vector<2x32xf32>
    %288 = arith.addf %286, %287 : vector<2x32xf32>
    %289 = math.tanh %288 : vector<2x32xf32>
    %290 = arith.mulf %285, %289 : vector<2x32xf32>
    %c18 = arith.constant 18 : index
    %c0_61 = arith.constant 0 : index
    %291 = vector.load %arg9[%c18, %c0_61] : memref<32x32xf32, #tpu.memory_space<vmem>>, vector<2x32xf32>
    tpu.vector_store %arg9[%c18, %c0_61], %290 {strides = array<i32>} : memref<32x32xf32, #tpu.memory_space<vmem>>, vector<2x32xf32>,
    %cst_62 = arith.constant dense<0.000000e+00> : vector<2x128xf32>
    %292 = tpu.matmul %290, %9, %cst_62 {dimension_numbers = #tpu.dot_dimension_numbers<[1], [0], [0], [1], [0, 0, 1, 1], [], []>} : vector<2x32xf32>, vector<32x128xf32>, vector<2x128xf32> -> vector<2x128xf32>
    %293 = arith.addf %8, %292 : vector<2x128xf32>
    %294 = vector.extract_strided_slice %293 {offsets = [0, 0], sizes = [2, 32], strides = [1, 1]} : vector<2x128xf32> to vector<2x32xf32>
    %295 = arith.negf %294 : vector<2x32xf32>
    %296 = math.exp %295 : vector<2x32xf32>
    %cst_63 = arith.constant 1.000000e+00 : f32
    %297 = vector.broadcast %cst_63 : f32 to vector<2x32xf32>
    %298 = arith.addf %297, %296 : vector<2x32xf32>
    %299 = arith.divf %297, %298 : vector<2x32xf32>
    %300 = vector.extract_strided_slice %293 {offsets = [0, 32], sizes = [2, 32], strides = [1, 1]} : vector<2x128xf32> to vector<2x32xf32>
    %301 = arith.negf %300 : vector<2x32xf32>
    %302 = math.exp %301 : vector<2x32xf32>
    %cst_64 = arith.constant 1.000000e+00 : f32
    %303 = vector.broadcast %cst_64 : f32 to vector<2x32xf32>
    %304 = arith.addf %303, %302 : vector<2x32xf32>
    %305 = arith.divf %303, %304 : vector<2x32xf32>
    %306 = vector.extract_strided_slice %293 {offsets = [0, 64], sizes = [2, 32], strides = [1, 1]} : vector<2x128xf32> to vector<2x32xf32>
    %307 = math.tanh %306 : vector<2x32xf32>
    %308 = vector.extract_strided_slice %293 {offsets = [0, 96], sizes = [2, 32], strides = [1, 1]} : vector<2x128xf32> to vector<2x32xf32>
    %309 = arith.negf %308 : vector<2x32xf32>
    %310 = math.exp %309 : vector<2x32xf32>
    %cst_65 = arith.constant 1.000000e+00 : f32
    %311 = vector.broadcast %cst_65 : f32 to vector<2x32xf32>
    %312 = arith.addf %311, %310 : vector<2x32xf32>
    %313 = arith.divf %311, %312 : vector<2x32xf32>
    %314 = arith.mulf %305, %288 : vector<2x32xf32>
    %315 = arith.mulf %299, %307 : vector<2x32xf32>
    %316 = arith.addf %314, %315 : vector<2x32xf32>
    %317 = math.tanh %316 : vector<2x32xf32>
    %318 = arith.mulf %313, %317 : vector<2x32xf32>
    %c20 = arith.constant 20 : index
    %c0_66 = arith.constant 0 : index
    %319 = vector.load %arg9[%c20, %c0_66] : memref<32x32xf32, #tpu.memory_space<vmem>>, vector<2x32xf32>
    tpu.vector_store %arg9[%c20, %c0_66], %318 {strides = array<i32>} : memref<32x32xf32, #tpu.memory_space<vmem>>, vector<2x32xf32>,
    %cst_67 = arith.constant dense<0.000000e+00> : vector<2x128xf32>
    %320 = tpu.matmul %318, %9, %cst_67 {dimension_numbers = #tpu.dot_dimension_numbers<[1], [0], [0], [1], [0, 0, 1, 1], [], []>} : vector<2x32xf32>, vector<32x128xf32>, vector<2x128xf32> -> vector<2x128xf32>
    %321 = arith.addf %8, %320 : vector<2x128xf32>
    %322 = vector.extract_strided_slice %321 {offsets = [0, 0], sizes = [2, 32], strides = [1, 1]} : vector<2x128xf32> to vector<2x32xf32>
    %323 = arith.negf %322 : vector<2x32xf32>
    %324 = math.exp %323 : vector<2x32xf32>
    %cst_68 = arith.constant 1.000000e+00 : f32
    %325 = vector.broadcast %cst_68 : f32 to vector<2x32xf32>
    %326 = arith.addf %325, %324 : vector<2x32xf32>
    %327 = arith.divf %325, %326 : vector<2x32xf32>
    %328 = vector.extract_strided_slice %321 {offsets = [0, 32], sizes = [2, 32], strides = [1, 1]} : vector<2x128xf32> to vector<2x32xf32>
    %329 = arith.negf %328 : vector<2x32xf32>
    %330 = math.exp %329 : vector<2x32xf32>
    %cst_69 = arith.constant 1.000000e+00 : f32
    %331 = vector.broadcast %cst_69 : f32 to vector<2x32xf32>
    %332 = arith.addf %331, %330 : vector<2x32xf32>
    %333 = arith.divf %331, %332 : vector<2x32xf32>
    %334 = vector.extract_strided_slice %321 {offsets = [0, 64], sizes = [2, 32], strides = [1, 1]} : vector<2x128xf32> to vector<2x32xf32>
    %335 = math.tanh %334 : vector<2x32xf32>
    %336 = vector.extract_strided_slice %321 {offsets = [0, 96], sizes = [2, 32], strides = [1, 1]} : vector<2x128xf32> to vector<2x32xf32>
    %337 = arith.negf %336 : vector<2x32xf32>
    %338 = math.exp %337 : vector<2x32xf32>
    %cst_70 = arith.constant 1.000000e+00 : f32
    %339 = vector.broadcast %cst_70 : f32 to vector<2x32xf32>
    %340 = arith.addf %339, %338 : vector<2x32xf32>
    %341 = arith.divf %339, %340 : vector<2x32xf32>
    %342 = arith.mulf %333, %316 : vector<2x32xf32>
    %343 = arith.mulf %327, %335 : vector<2x32xf32>
    %344 = arith.addf %342, %343 : vector<2x32xf32>
    %345 = math.tanh %344 : vector<2x32xf32>
    %346 = arith.mulf %341, %345 : vector<2x32xf32>
    %c22 = arith.constant 22 : index
    %c0_71 = arith.constant 0 : index
    %347 = vector.load %arg9[%c22, %c0_71] : memref<32x32xf32, #tpu.memory_space<vmem>>, vector<2x32xf32>
    tpu.vector_store %arg9[%c22, %c0_71], %346 {strides = array<i32>} : memref<32x32xf32, #tpu.memory_space<vmem>>, vector<2x32xf32>,
    %cst_72 = arith.constant dense<0.000000e+00> : vector<2x128xf32>
    %348 = tpu.matmul %346, %9, %cst_72 {dimension_numbers = #tpu.dot_dimension_numbers<[1], [0], [0], [1], [0, 0, 1, 1], [], []>} : vector<2x32xf32>, vector<32x128xf32>, vector<2x128xf32> -> vector<2x128xf32>
    %349 = arith.addf %8, %348 : vector<2x128xf32>
    %350 = vector.extract_strided_slice %349 {offsets = [0, 0], sizes = [2, 32], strides = [1, 1]} : vector<2x128xf32> to vector<2x32xf32>
    %351 = arith.negf %350 : vector<2x32xf32>
    %352 = math.exp %351 : vector<2x32xf32>
    %cst_73 = arith.constant 1.000000e+00 : f32
    %353 = vector.broadcast %cst_73 : f32 to vector<2x32xf32>
    %354 = arith.addf %353, %352 : vector<2x32xf32>
    %355 = arith.divf %353, %354 : vector<2x32xf32>
    %356 = vector.extract_strided_slice %349 {offsets = [0, 32], sizes = [2, 32], strides = [1, 1]} : vector<2x128xf32> to vector<2x32xf32>
    %357 = arith.negf %356 : vector<2x32xf32>
    %358 = math.exp %357 : vector<2x32xf32>
    %cst_74 = arith.constant 1.000000e+00 : f32
    %359 = vector.broadcast %cst_74 : f32 to vector<2x32xf32>
    %360 = arith.addf %359, %358 : vector<2x32xf32>
    %361 = arith.divf %359, %360 : vector<2x32xf32>
    %362 = vector.extract_strided_slice %349 {offsets = [0, 64], sizes = [2, 32], strides = [1, 1]} : vector<2x128xf32> to vector<2x32xf32>
    %363 = math.tanh %362 : vector<2x32xf32>
    %364 = vector.extract_strided_slice %349 {offsets = [0, 96], sizes = [2, 32], strides = [1, 1]} : vector<2x128xf32> to vector<2x32xf32>
    %365 = arith.negf %364 : vector<2x32xf32>
    %366 = math.exp %365 : vector<2x32xf32>
    %cst_75 = arith.constant 1.000000e+00 : f32
    %367 = vector.broadcast %cst_75 : f32 to vector<2x32xf32>
    %368 = arith.addf %367, %366 : vector<2x32xf32>
    %369 = arith.divf %367, %368 : vector<2x32xf32>
    %370 = arith.mulf %361, %344 : vector<2x32xf32>
    %371 = arith.mulf %355, %363 : vector<2x32xf32>
    %372 = arith.addf %370, %371 : vector<2x32xf32>
    %373 = math.tanh %372 : vector<2x32xf32>
    %374 = arith.mulf %369, %373 : vector<2x32xf32>
    %c24 = arith.constant 24 : index
    %c0_76 = arith.constant 0 : index
    %375 = vector.load %arg9[%c24, %c0_76] : memref<32x32xf32, #tpu.memory_space<vmem>>, vector<2x32xf32>
    tpu.vector_store %arg9[%c24, %c0_76], %374 {strides = array<i32>} : memref<32x32xf32, #tpu.memory_space<vmem>>, vector<2x32xf32>,
    %cst_77 = arith.constant dense<0.000000e+00> : vector<2x128xf32>
    %376 = tpu.matmul %374, %9, %cst_77 {dimension_numbers = #tpu.dot_dimension_numbers<[1], [0], [0], [1], [0, 0, 1, 1], [], []>} : vector<2x32xf32>, vector<32x128xf32>, vector<2x128xf32> -> vector<2x128xf32>
    %377 = arith.addf %8, %376 : vector<2x128xf32>
    %378 = vector.extract_strided_slice %377 {offsets = [0, 0], sizes = [2, 32], strides = [1, 1]} : vector<2x128xf32> to vector<2x32xf32>
    %379 = arith.negf %378 : vector<2x32xf32>
    %380 = math.exp %379 : vector<2x32xf32>
    %cst_78 = arith.constant 1.000000e+00 : f32
    %381 = vector.broadcast %cst_78 : f32 to vector<2x32xf32>
    %382 = arith.addf %381, %380 : vector<2x32xf32>
    %383 = arith.divf %381, %382 : vector<2x32xf32>
    %384 = vector.extract_strided_slice %377 {offsets = [0, 32], sizes = [2, 32], strides = [1, 1]} : vector<2x128xf32> to vector<2x32xf32>
    %385 = arith.negf %384 : vector<2x32xf32>
    %386 = math.exp %385 : vector<2x32xf32>
    %cst_79 = arith.constant 1.000000e+00 : f32
    %387 = vector.broadcast %cst_79 : f32 to vector<2x32xf32>
    %388 = arith.addf %387, %386 : vector<2x32xf32>
    %389 = arith.divf %387, %388 : vector<2x32xf32>
    %390 = vector.extract_strided_slice %377 {offsets = [0, 64], sizes = [2, 32], strides = [1, 1]} : vector<2x128xf32> to vector<2x32xf32>
    %391 = math.tanh %390 : vector<2x32xf32>
    %392 = vector.extract_strided_slice %377 {offsets = [0, 96], sizes = [2, 32], strides = [1, 1]} : vector<2x128xf32> to vector<2x32xf32>
    %393 = arith.negf %392 : vector<2x32xf32>
    %394 = math.exp %393 : vector<2x32xf32>
    %cst_80 = arith.constant 1.000000e+00 : f32
    %395 = vector.broadcast %cst_80 : f32 to vector<2x32xf32>
    %396 = arith.addf %395, %394 : vector<2x32xf32>
    %397 = arith.divf %395, %396 : vector<2x32xf32>
    %398 = arith.mulf %389, %372 : vector<2x32xf32>
    %399 = arith.mulf %383, %391 : vector<2x32xf32>
    %400 = arith.addf %398, %399 : vector<2x32xf32>
    %401 = math.tanh %400 : vector<2x32xf32>
    %402 = arith.mulf %397, %401 : vector<2x32xf32>
    %c26 = arith.constant 26 : index
    %c0_81 = arith.constant 0 : index
    %403 = vector.load %arg9[%c26, %c0_81] : memref<32x32xf32, #tpu.memory_space<vmem>>, vector<2x32xf32>
    tpu.vector_store %arg9[%c26, %c0_81], %402 {strides = array<i32>} : memref<32x32xf32, #tpu.memory_space<vmem>>, vector<2x32xf32>,
    %cst_82 = arith.constant dense<0.000000e+00> : vector<2x128xf32>
    %404 = tpu.matmul %402, %9, %cst_82 {dimension_numbers = #tpu.dot_dimension_numbers<[1], [0], [0], [1], [0, 0, 1, 1], [], []>} : vector<2x32xf32>, vector<32x128xf32>, vector<2x128xf32> -> vector<2x128xf32>
    %405 = arith.addf %8, %404 : vector<2x128xf32>
    %406 = vector.extract_strided_slice %405 {offsets = [0, 0], sizes = [2, 32], strides = [1, 1]} : vector<2x128xf32> to vector<2x32xf32>
    %407 = arith.negf %406 : vector<2x32xf32>
    %408 = math.exp %407 : vector<2x32xf32>
    %cst_83 = arith.constant 1.000000e+00 : f32
    %409 = vector.broadcast %cst_83 : f32 to vector<2x32xf32>
    %410 = arith.addf %409, %408 : vector<2x32xf32>
    %411 = arith.divf %409, %410 : vector<2x32xf32>
    %412 = vector.extract_strided_slice %405 {offsets = [0, 32], sizes = [2, 32], strides = [1, 1]} : vector<2x128xf32> to vector<2x32xf32>
    %413 = arith.negf %412 : vector<2x32xf32>
    %414 = math.exp %413 : vector<2x32xf32>
    %cst_84 = arith.constant 1.000000e+00 : f32
    %415 = vector.broadcast %cst_84 : f32 to vector<2x32xf32>
    %416 = arith.addf %415, %414 : vector<2x32xf32>
    %417 = arith.divf %415, %416 : vector<2x32xf32>
    %418 = vector.extract_strided_slice %405 {offsets = [0, 64], sizes = [2, 32], strides = [1, 1]} : vector<2x128xf32> to vector<2x32xf32>
    %419 = math.tanh %418 : vector<2x32xf32>
    %420 = vector.extract_strided_slice %405 {offsets = [0, 96], sizes = [2, 32], strides = [1, 1]} : vector<2x128xf32> to vector<2x32xf32>
    %421 = arith.negf %420 : vector<2x32xf32>
    %422 = math.exp %421 : vector<2x32xf32>
    %cst_85 = arith.constant 1.000000e+00 : f32
    %423 = vector.broadcast %cst_85 : f32 to vector<2x32xf32>
    %424 = arith.addf %423, %422 : vector<2x32xf32>
    %425 = arith.divf %423, %424 : vector<2x32xf32>
    %426 = arith.mulf %417, %400 : vector<2x32xf32>
    %427 = arith.mulf %411, %419 : vector<2x32xf32>
    %428 = arith.addf %426, %427 : vector<2x32xf32>
    %429 = math.tanh %428 : vector<2x32xf32>
    %430 = arith.mulf %425, %429 : vector<2x32xf32>
    %c28 = arith.constant 28 : index
    %c0_86 = arith.constant 0 : index
    %431 = vector.load %arg9[%c28, %c0_86] : memref<32x32xf32, #tpu.memory_space<vmem>>, vector<2x32xf32>
    tpu.vector_store %arg9[%c28, %c0_86], %430 {strides = array<i32>} : memref<32x32xf32, #tpu.memory_space<vmem>>, vector<2x32xf32>,
    %cst_87 = arith.constant dense<0.000000e+00> : vector<2x128xf32>
    %432 = tpu.matmul %430, %9, %cst_87 {dimension_numbers = #tpu.dot_dimension_numbers<[1], [0], [0], [1], [0, 0, 1, 1], [], []>} : vector<2x32xf32>, vector<32x128xf32>, vector<2x128xf32> -> vector<2x128xf32>
    %433 = arith.addf %8, %432 : vector<2x128xf32>
    %434 = vector.extract_strided_slice %433 {offsets = [0, 0], sizes = [2, 32], strides = [1, 1]} : vector<2x128xf32> to vector<2x32xf32>
    %435 = arith.negf %434 : vector<2x32xf32>
    %436 = math.exp %435 : vector<2x32xf32>
    %cst_88 = arith.constant 1.000000e+00 : f32
    %437 = vector.broadcast %cst_88 : f32 to vector<2x32xf32>
    %438 = arith.addf %437, %436 : vector<2x32xf32>
    %439 = arith.divf %437, %438 : vector<2x32xf32>
    %440 = vector.extract_strided_slice %433 {offsets = [0, 32], sizes = [2, 32], strides = [1, 1]} : vector<2x128xf32> to vector<2x32xf32>
    %441 = arith.negf %440 : vector<2x32xf32>
    %442 = math.exp %441 : vector<2x32xf32>
    %cst_89 = arith.constant 1.000000e+00 : f32
    %443 = vector.broadcast %cst_89 : f32 to vector<2x32xf32>
    %444 = arith.addf %443, %442 : vector<2x32xf32>
    %445 = arith.divf %443, %444 : vector<2x32xf32>
    %446 = vector.extract_strided_slice %433 {offsets = [0, 64], sizes = [2, 32], strides = [1, 1]} : vector<2x128xf32> to vector<2x32xf32>
    %447 = math.tanh %446 : vector<2x32xf32>
    %448 = vector.extract_strided_slice %433 {offsets = [0, 96], sizes = [2, 32], strides = [1, 1]} : vector<2x128xf32> to vector<2x32xf32>
    %449 = arith.negf %448 : vector<2x32xf32>
    %450 = math.exp %449 : vector<2x32xf32>
    %cst_90 = arith.constant 1.000000e+00 : f32
    %451 = vector.broadcast %cst_90 : f32 to vector<2x32xf32>
    %452 = arith.addf %451, %450 : vector<2x32xf32>
    %453 = arith.divf %451, %452 : vector<2x32xf32>
    %454 = arith.mulf %445, %428 : vector<2x32xf32>
    %455 = arith.mulf %439, %447 : vector<2x32xf32>
    %456 = arith.addf %454, %455 : vector<2x32xf32>
    %457 = math.tanh %456 : vector<2x32xf32>
    %458 = arith.mulf %453, %457 : vector<2x32xf32>
    %c30 = arith.constant 30 : index
    %c0_91 = arith.constant 0 : index
    %459 = vector.load %arg9[%c30, %c0_91] : memref<32x32xf32, #tpu.memory_space<vmem>>, vector<2x32xf32>
    tpu.vector_store %arg9[%c30, %c0_91], %458 {strides = array<i32>} : memref<32x32xf32, #tpu.memory_space<vmem>>, vector<2x32xf32>,
    %c0_92 = arith.constant 0 : index
    %c0_93 = arith.constant 0 : index
    %460 = vector.load %arg9[%c0_92, %c0_93] : memref<32x32xf32, #tpu.memory_space<vmem>>, vector<32x32xf32>
    %c0_94 = arith.constant 0 : index
    %c0_95 = arith.constant 0 : index
    %461 = vector.load %arg6[%c0_94, %c0_95] : memref<32x8xf32, #tpu.memory_space<vmem>>, vector<32x8xf32>
    %cst_96 = arith.constant dense<0.000000e+00> : vector<32x8xf32>
    %462 = tpu.matmul %460, %461, %cst_96 {dimension_numbers = #tpu.dot_dimension_numbers<[1], [0], [0], [1], [0, 0, 1, 1], [], []>} : vector<32x32xf32>, vector<32x8xf32>, vector<32x8xf32> -> vector<32x8xf32>
    %c0_97 = arith.constant 0 : index
    %c0_98 = arith.constant 0 : index
    %463 = vector.load %arg7[%c0_97, %c0_98] : memref<1x8xf32, #tpu.memory_space<vmem>>, vector<1x8xf32>
    %464 = vector.broadcast %463 : vector<1x8xf32> to vector<32x8xf32>
    %465 = arith.addf %462, %464 : vector<32x8xf32>
    %c0_99 = arith.constant 0 : index
    %c0_100 = arith.constant 0 : index
    %466 = vector.load %arg8[%c0_99, %c0_100] : memref<32x8xf32, #tpu.memory_space<vmem>>, vector<32x8xf32>
    tpu.vector_store %arg8[%c0_99, %c0_100], %465 {strides = array<i32>} : memref<32x8xf32, #tpu.memory_space<vmem>>, vector<32x8xf32>,
    return
  }
  func.func @transform_0(%arg0: i32) -> (i32, i32) {
    %c0_i32 = arith.constant 0 : i32
    %c0_i32_0 = arith.constant 0 : i32
    %c0_i32_1 = arith.constant 0 : i32
    return %c0_i32, %c0_i32_0 : i32, i32
  }
  func.func @transform_1(%arg0: i32) -> (i32, i32) {
    %c0_i32 = arith.constant 0 : i32
    %c0_i32_0 = arith.constant 0 : i32
    %c0_i32_1 = arith.constant 0 : i32
    return %c0_i32, %c0_i32_0 : i32, i32
  }
  func.func @transform_2(%arg0: i32) -> (i32, i32) {
    %c0_i32 = arith.constant 0 : i32
    %c0_i32_0 = arith.constant 0 : i32
    %c0_i32_1 = arith.constant 0 : i32
    return %c0_i32, %c0_i32_0 : i32, i32
  }
  func.func @transform_3(%arg0: i32) -> (i32, i32) {
    %c0_i32 = arith.constant 0 : i32
    %c0_i32_0 = arith.constant 0 : i32
    %c0_i32_1 = arith.constant 0 : i32
    return %c0_i32, %c0_i32_0 : i32, i32
  }
  func.func @transform_4(%arg0: i32) -> (i32, i32) {
    %c0_i32 = arith.constant 0 : i32
    %c0_i32_0 = arith.constant 0 : i32
    %c0_i32_1 = arith.constant 0 : i32
    return %c0_i32, %c0_i32_0 : i32, i32
  }
  func.func @transform_5(%arg0: i32) -> (i32, i32) {
    %c0_i32 = arith.constant 0 : i32
    %c0_i32_0 = arith.constant 0 : i32
    %c0_i32_1 = arith.constant 0 : i32
    return %c0_i32, %c0_i32_0 : i32, i32
  }
  func.func @transform_6(%arg0: i32) -> (i32, i32) {
    %c0_i32 = arith.constant 0 : i32
    %c0_i32_0 = arith.constant 0 : i32
    %c0_i32_1 = arith.constant 0 : i32
    return %c0_i32, %c0_i32_0 : i32, i32
  }
  func.func @transform_7(%arg0: i32) -> (i32, i32) {
    %c0_i32 = arith.constant 0 : i32
    %c0_i32_0 = arith.constant 0 : i32
    %c0_i32_1 = arith.constant 0 : i32
    return %c0_i32, %c0_i32_0 : i32, i32
  }
}

</mosaic_0001>

<bundles_post_ra>
// kernel: tpu_custom_call.1
= control target key start
LH: loop header
LB: loop body
LE: loop exit
PB: predicated region body
PF: predicated region fallthrough
CT: control target
= control target key end

     0   :  { %v2334_v0 = vmov 0   ;;  %v2335_v2 = vmov 0.0   ;;  %vm2336_vm0 = vmmov 0   ;;  %vm42_vm1 = vcmask 64512   ;;  %s2337_s14 = smov 64   ;;  %s2734_s1 = inlined_call_operand.vmem [shape: f32[2,1], index: 1, kind: input, shape index: {}]   ;;  %s2735_s3 = inlined_call_operand.vmem [shape: f32[32,128], index: 3, kind: input, shape index: {}]   ;;  %s2736_s2 = inlined_call_operand.vmem [shape: f32[8,128], index: 2, kind: input, shape index: {}]   ;;  %s2737_s0 = inlined_call_operand.vmem [shape: f32[2,8], index: 0, kind: input, shape index: {}]   ;;  %s2738_s4 = inlined_call_operand.vmem [shape: f32[1,128], index: 4, kind: input, shape index: {}]   ;;  %s2739_s5 = inlined_call_operand.vmem [shape: f32[32,8], index: 5, kind: input, shape index: {}]   ;;  %s2740_s6 = inlined_call_operand.vmem [shape: f32[1,8], index: 6, kind: input, shape index: {}]   ;;  %s2741_s7 = inlined_call_operand.vmem [shape: f32[32,8], index: 7, kind: output, shape index: {}]  }
   0x1   :  { %2203 = vset.pattern.permute.xlu0 %v2334_v0  ;;  %v26_v1 = vld [vmem:[%s2734_s1] sm:$0x3]  ;;  %2008 = vmatprep.subr.mxu0 %v2335_v2  ;;  %v2386_v3 = vld [vmem:[%s2735_s3 + $0x18] sm:$0xff]  ;;  %v2391_v4 = vld [vmem:[%s2735_s3 + $0x10] sm:$0xff]  ;;  %vm223_vm2 = vcmask 254976   ;;  %vm120_vm3 = vcmask 261120  }
   0x2   :  { %30 = vperm.xlu0 %2203, %v26_v1   ;;  %2009 = vmatpush3.msra.mxu0 %v2386_v3  ;;  %v34_v5 = vld [vmem:[%s2736_s2] sm:$0xff]  ;;  %v2401_v6 = vld [vmem:[%s2735_s3 + $0x8] sm:$0xff] }
   0x3   :  { %2010 = vmatprep.subr.mxu0 %v2335_v2  ;;  %2003 = vmatprep.subr.mxu1 %v2335_v2  ;;  %v2411_v7 = vld [vmem:[%s2735_s3] sm:$0xff] }
   0x4   :  { %2011 = vmatpush3.msra.mxu0 %v2391_v4  ;;  %2004 = vmatpush3.msra.mxu1 %v34_v5  ;;  %v27_v8 = vld [vmem:[%s2737_s0] sm:$0x3] }
   0x5   :  { %2012 = vmatprep.subr.mxu0 %v2335_v2  ;;  %2005 = vmatprep.mubr.msk.f32.mxu1 %vm2336_vm0, %v2335_v2  ;;  %v1875_v13 = vld [vmem:[%s2738_s4] ss:$0 sm:$0xff]  ;;  %s2338_s4 = smov 32  }
   0x6   :  { %2013 = vmatpush3.msra.mxu0 %v2401_v6  ;;  %2016 = vmatprep.mubr.msk.f32.mxu0 %vm2336_vm0, %v2335_v2 }
   0x7   :  { %2014 = vmatprep.subr.mxu0 %v2335_v2  ;;  %2030 = vmatprep.subr.mxu1 %v2335_v2 }
   0x8   :  { %2015 = vmatpush3.msra.mxu0 %v2411_v7 }
   0x9   :  { %2017 = vmatmul.mubr.f32.vlgmr.msra.gmra.mxu0 %v2335_v2  ;;  %2019 = vmatprep.subr.mxu0 %v2335_v2 }
   0xa   :  { %2020 = vmatpush3.msra.mxu0 %v2386_v3  ;;  %2027 = vmatprep.mubr.msk.f32.mxu0 %vm2336_vm0, %v2335_v2 }
   0xb   :  { %2021 = vmatprep.subr.mxu0 %v2335_v2 }
   0xc   :  { %2022 = vmatpush3.msra.mxu0 %v2391_v4 }
   0xd   :  { %2023 = vmatprep.subr.mxu0 %v2335_v2 }
   0xe   :  { %2024 = vmatpush3.msra.mxu0 %v2401_v6 }
   0xf   :  { %2025 = vmatprep.subr.mxu0 %v2335_v2 }
  0x10   :  { %2026 = vmatpush3.msra.mxu0 %v2411_v7 }
  0x11   :  { %2041 = vmatprep.subr.mxu0 %v2335_v2 }
  0x7d   :  { %v31_v9 = vpop.permute.xlu0 %30 }
  0x7e   :  { %v33_v10 = vmul.f32 %v31_v9, %v27_v8 }
  0x80   :  { %2006 = vmatmul.mubr.msk.f32.vlgmr.msra.gmra.mxu1 %vm42_vm1, %v33_v10 }
  0x81   :  { %2031 = vmatpush3.msra.mxu1 %v2386_v3  ;;  %2038 = vmatprep.mubr.msk.f32.mxu1 %vm2336_vm0, %v2335_v2 }
  0x82   :  { %2032 = vmatprep.subr.mxu1 %v2335_v2 }
  0x83   :  { %2033 = vmatpush3.msra.mxu1 %v2391_v4 }
  0x84   :  { %2034 = vmatprep.subr.mxu1 %v2335_v2 }
  0x85   :  { %2035 = vmatpush3.msra.mxu1 %v2401_v6 }
  0x86   :  { %2036 = vmatprep.subr.mxu1 %v2335_v2 }
  0x87   :  { %2037 = vmatpush3.msra.mxu1 %v2411_v7 }
  0x88   :  { %2052 = vmatprep.subr.mxu1 %v2335_v2 }
  0xc9   :  { %v190_v11 = vpop.f32.mrf.mxu0 }
  0xcb   :  { %v2018_v12 = vpop.f32.mrf.mxu0 }
 0x140   :  { %v112_v14 = vpop.f32.mrf.mxu1 }
 0x141   :  { %v2448_v15 = vadd.f32 %v1875_v13, %v112_v14 }
 0x142   :  { %v2007_v16 = vpop.f32.mrf.mxu1 }
 0x143   :  { %v194_v17 = vadd.f32 %v190_v11, %v2448_v15 }
 0x145   :  { %2204 = vtanh.f32 %v194_v17  ;;  %v1877_v19 = vmul.f32 -1.442695, %v194_v17 }
 0x147   :  { %2206 = vpow2.f32 %v1877_v19 }
 0x152   :  { %v2205_v18 = vpop.eup %2204 }
 0x153   :  { %204 = vrot.lane.b32.xlu0 %v2205_v18, %s2337_s14 }
 0x154   :  { %v2207_v20 = vpop.eup %2206 }
 0x155   :  { %v198_v21 = vadd.f32 1.0, %v2207_v20 }
 0x157   :  { %2208 = vrcp.f32 %v198_v21 }
 0x164   :  { %v2209_v22 = vpop.eup %2208 }
 0x165   :  { %v202_v25 = vmul.f32 0.0, %v2209_v22 }
 0x1c5   :  { %v205_v23 = vpop.permute.xlu0 %204 }
 0x1c6   :  { %v207_v24 = vmul.f32 %v2209_v22, %v205_v23 }
 0x1c8   :  { %209 = vrot.lane.b32.xlu1 %v207_v24, %s2338_s4 }
 0x23a   :  { %v210_v26 = vpop.permute.xlu1 %209 }
 0x23b   :  { %v212_v27 = vadd.f32 %v210_v26, %v202_v25 }
 0x23d   :  { %2210 = vtanh.f32 %v212_v27 }
 0x24a   :  { %v2211_v28 = vpop.eup %2210 }
 0x24b   :  { %215 = vrot.lane.b32.xlu1 %v2211_v28, %s2337_s14 }
 0x2bd   :  { %v216_v29 = vpop.permute.xlu1 %215 }
 0x2be   :  { %v218_v30 = vmul.f32 %v2209_v22, %v216_v29 }
 0x2c0   :  { %220 = vrot.lane.b32.xlu0 %v218_v30, %s2338_s4 }
 0x332   :  { %v221_v31 = vpop.permute.xlu0 %220 }
 0x333   :  { %224 = vst.msk [vmem:[#allocation2] sm:$0x3] %vm223_vm2, %v221_v31  ;;  %2028 = vmatmul.mubr.msk.f32.vlgmr.msra.gmra.mxu0 %vm120_vm3, %v221_v31 }
 0x334   :  { %2042 = vmatpush3.msra.mxu0 %v2386_v3  ;;  %2049 = vmatprep.mubr.msk.f32.mxu0 %vm2336_vm0, %v2335_v2 }
 0x335   :  { %2043 = vmatprep.subr.mxu0 %v2335_v2 }
 0x336   :  { %2044 = vmatpush3.msra.mxu0 %v2391_v4 }
 0x337   :  { %2045 = vmatprep.subr.mxu0 %v2335_v2 }
 0x338   :  { %2046 = vmatpush3.msra.mxu0 %v2401_v6 }
 0x339   :  { %2047 = vmatprep.subr.mxu0 %v2335_v2 }
 0x33a   :  { %2048 = vmatpush3.msra.mxu0 %v2411_v7 }
 0x33b   :  { %2063 = vmatprep.subr.mxu0 %v2335_v2 }
 0x3f3   :  { %v293_v32 = vpop.f32.mrf.mxu0 }
 0x3f4   :  { %v297_v33 = vadd.f32 %v293_v32, %v2448_v15 }
 0x3f5   :  { %v2029_v34 = vpop.f32.mrf.mxu0 }
 0x3f6   :  { %2212 = vtanh.f32 %v297_v33  ;;  %v1879_v36 = vmul.f32 -1.442695, %v297_v33 }
 0x3f8   :  { %2214 = vpow2.f32 %v1879_v36 }
 0x403   :  { %v2213_v35 = vpop.eup %2212 }
 0x404   :  { %307 = vrot.lane.b32.xlu1 %v2213_v35, %s2337_s14 }
 0x405   :  { %v2215_v37 = vpop.eup %2214 }
 0x406   :  { %v301_v38 = vadd.f32 1.0, %v2215_v37 }
 0x408   :  { %2216 = vrcp.f32 %v301_v38 }
 0x415   :  { %v2217_v39 = vpop.eup %2216 }
 0x416   :  { %v305_v42 = vmul.f32 %v2217_v39, %v212_v27 }
 0x476   :  { %v308_v40 = vpop.permute.xlu1 %307 }
 0x477   :  { %v310_v41 = vmul.f32 %v2217_v39, %v308_v40 }
 0x479   :  { %312 = vrot.lane.b32.xlu0 %v310_v41, %s2338_s4 }
 0x4eb   :  { %v313_v43 = vpop.permute.xlu0 %312 }
 0x4ec   :  { %v315_v44 = vadd.f32 %v313_v43, %v305_v42 }
 0x4ee   :  { %2218 = vtanh.f32 %v315_v44 }
 0x4fb   :  { %v2219_v45 = vpop.eup %2218 }
 0x4fc   :  { %318 = vrot.lane.b32.xlu1 %v2219_v45, %s2337_s14 }
 0x56e   :  { %v319_v46 = vpop.permute.xlu1 %318 }
 0x56f   :  { %v321_v47 = vmul.f32 %v2217_v39, %v319_v46 }
 0x571   :  { %323 = vrot.lane.b32.xlu0 %v321_v47, %s2338_s4 }
 0x5e3   :  { %v324_v48 = vpop.permute.xlu0 %323 }
 0x5e4   :  { %326 = vst.msk [vmem:[#allocation2 + $0x2] sm:$0x3] %vm223_vm2, %v324_v48  ;;  %2039 = vmatmul.mubr.msk.f32.vlgmr.msra.gmra.mxu1 %vm120_vm3, %v324_v48 }
 0x5e5   :  { %2053 = vmatpush3.msra.mxu1 %v2386_v3  ;;  %2060 = vmatprep.mubr.msk.f32.mxu1 %vm2336_vm0, %v2335_v2 }
 0x5e6   :  { %2054 = vmatprep.subr.mxu1 %v2335_v2 }
 0x5e7   :  { %2055 = vmatpush3.msra.mxu1 %v2391_v4 }
 0x5e8   :  { %2056 = vmatprep.subr.mxu1 %v2335_v2 }
 0x5e9   :  { %2057 = vmatpush3.msra.mxu1 %v2401_v6 }
 0x5ea   :  { %2058 = vmatprep.subr.mxu1 %v2335_v2 }
 0x5eb   :  { %2059 = vmatpush3.msra.mxu1 %v2411_v7 }
 0x5ec   :  { %2074 = vmatprep.subr.mxu1 %v2335_v2 }
 0x6a4   :  { %v395_v49 = vpop.f32.mrf.mxu1 }
 0x6a5   :  { %v399_v50 = vadd.f32 %v395_v49, %v2448_v15 }
 0x6a6   :  { %v2040_v51 = vpop.f32.mrf.mxu1 }
 0x6a7   :  { %2220 = vtanh.f32 %v399_v50  ;;  %v1881_v53 = vmul.f32 -1.442695, %v399_v50 }
 0x6a9   :  { %2222 = vpow2.f32 %v1881_v53 }
 0x6b4   :  { %v2221_v52 = vpop.eup %2220 }
 0x6b5   :  { %409 = vrot.lane.b32.xlu1 %v2221_v52, %s2337_s14 }
 0x6b6   :  { %v2223_v54 = vpop.eup %2222 }
 0x6b7   :  { %v403_v55 = vadd.f32 1.0, %v2223_v54 }
 0x6b9   :  { %2224 = vrcp.f32 %v403_v55 }
 0x6c6   :  { %v2225_v56 = vpop.eup %2224 }
 0x6c7   :  { %v407_v59 = vmul.f32 %v2225_v56, %v315_v44 }
 0x727   :  { %v410_v57 = vpop.permute.xlu1 %409 }
 0x728   :  { %v412_v58 = vmul.f32 %v2225_v56, %v410_v57 }
 0x72a   :  { %414 = vrot.lane.b32.xlu0 %v412_v58, %s2338_s4 }
 0x79c   :  { %v415_v60 = vpop.permute.xlu0 %414 }
 0x79d   :  { %v417_v61 = vadd.f32 %v415_v60, %v407_v59 }
 0x79f   :  { %2226 = vtanh.f32 %v417_v61 }
 0x7ac   :  { %v2227_v62 = vpop.eup %2226 }
 0x7ad   :  { %420 = vrot.lane.b32.xlu1 %v2227_v62, %s2337_s14 }
 0x81f   :  { %v421_v63 = vpop.permute.xlu1 %420 }
 0x820   :  { %v423_v0 = vmul.f32 %v2225_v56, %v421_v63 }
 0x822   :  { %425 = vrot.lane.b32.xlu0 %v423_v0, %s2338_s4 }
 0x894   :  { %v426_v1 = vpop.permute.xlu0 %425 }
 0x895   :  { %428 = vst.msk [vmem:[#allocation2 + $0x4] sm:$0x3] %vm223_vm2, %v426_v1  ;;  %2050 = vmatmul.mubr.msk.f32.vlgmr.msra.gmra.mxu0 %vm120_vm3, %v426_v1 }
 0x896   :  { %2064 = vmatpush3.msra.mxu0 %v2386_v3  ;;  %2071 = vmatprep.mubr.msk.f32.mxu0 %vm2336_vm0, %v2335_v2 }
 0x897   :  { %2065 = vmatprep.subr.mxu0 %v2335_v2 }
 0x898   :  { %2066 = vmatpush3.msra.mxu0 %v2391_v4 }
 0x899   :  { %2067 = vmatprep.subr.mxu0 %v2335_v2 }
 0x89a   :  { %2068 = vmatpush3.msra.mxu0 %v2401_v6 }
 0x89b   :  { %2069 = vmatprep.subr.mxu0 %v2335_v2 }
 0x89c   :  { %2070 = vmatpush3.msra.mxu0 %v2411_v7 }
 0x89d   :  { %2085 = vmatprep.subr.mxu0 %v2335_v2 }
 0x955   :  { %v497_v5 = vpop.f32.mrf.mxu0 }
 0x956   :  { %v501_v8 = vadd.f32 %v497_v5, %v2448_v15 }
 0x957   :  { %v2051_v9 = vpop.f32.mrf.mxu0 }
 0x958   :  { %2228 = vtanh.f32 %v501_v8  ;;  %v1883_v11 = vmul.f32 -1.442695, %v501_v8 }
 0x95a   :  { %2230 = vpow2.f32 %v1883_v11 }
 0x965   :  { %v2229_v10 = vpop.eup %2228 }
 0x966   :  { %511 = vrot.lane.b32.xlu1 %v2229_v10, %s2337_s14 }
 0x967   :  { %v2231_v12 = vpop.eup %2230 }
 0x968   :  { %v505_v13 = vadd.f32 1.0, %v2231_v12 }
 0x96a   :  { %2232 = vrcp.f32 %v505_v13 }
 0x977   :  { %v2233_v14 = vpop.eup %2232 }
 0x978   :  { %v509_v18 = vmul.f32 %v2233_v14, %v417_v61 }
 0x9d8   :  { %v512_v16 = vpop.permute.xlu1 %511 }
 0x9d9   :  { %v514_v17 = vmul.f32 %v2233_v14, %v512_v16 }
 0x9db   :  { %516 = vrot.lane.b32.xlu0 %v514_v17, %s2338_s4 }
 0xa4d   :  { %v517_v19 = vpop.permute.xlu0 %516 }
 0xa4e   :  { %v519_v20 = vadd.f32 %v517_v19, %v509_v18 }
 0xa50   :  { %2234 = vtanh.f32 %v519_v20 }
 0xa5d   :  { %v2235_v21 = vpop.eup %2234 }
 0xa5e   :  { %522 = vrot.lane.b32.xlu1 %v2235_v21, %s2337_s14 }
 0xad0   :  { %v523_v22 = vpop.permute.xlu1 %522 }
 0xad1   :  { %v525_v23 = vmul.f32 %v2233_v14, %v523_v22 }
 0xad3   :  { %527 = vrot.lane.b32.xlu0 %v525_v23, %s2338_s4 }
 0xb45   :  { %v528_v24 = vpop.permute.xlu0 %527 }
 0xb46   :  { %530 = vst.msk [vmem:[#allocation2 + $0x6] sm:$0x3] %vm223_vm2, %v528_v24  ;;  %2061 = vmatmul.mubr.msk.f32.vlgmr.msra.gmra.mxu1 %vm120_vm3, %v528_v24 }
 0xb47   :  { %2075 = vmatpush3.msra.mxu1 %v2386_v3  ;;  %2082 = vmatprep.mubr.msk.f32.mxu1 %vm2336_vm0, %v2335_v2 }
 0xb48   :  { %2076 = vmatprep.subr.mxu1 %v2335_v2 }
 0xb49   :  { %2077 = vmatpush3.msra.mxu1 %v2391_v4 }
 0xb4a   :  { %2078 = vmatprep.subr.mxu1 %v2335_v2 }
 0xb4b   :  { %2079 = vmatpush3.msra.mxu1 %v2401_v6 }
 0xb4c   :  { %2080 = vmatprep.subr.mxu1 %v2335_v2 }
 0xb4d   :  { %2081 = vmatpush3.msra.mxu1 %v2411_v7 }
 0xb4e   :  { %2096 = vmatprep.subr.mxu1 %v2335_v2 }
 0xc06   :  { %v599_v25 = vpop.f32.mrf.mxu1 }
 0xc07   :  { %v603_v26 = vadd.f32 %v599_v25, %v2448_v15 }
 0xc08   :  { %v2062_v27 = vpop.f32.mrf.mxu1 }
 0xc09   :  { %2236 = vtanh.f32 %v603_v26  ;;  %v1885_v29 = vmul.f32 -1.442695, %v603_v26 }
 0xc0b   :  { %2238 = vpow2.f32 %v1885_v29 }
 0xc16   :  { %v2237_v28 = vpop.eup %2236 }
 0xc17   :  { %613 = vrot.lane.b32.xlu1 %v2237_v28, %s2337_s14 }
 0xc18   :  { %v2239_v30 = vpop.eup %2238 }
 0xc19   :  { %v607_v31 = vadd.f32 1.0, %v2239_v30 }
 0xc1b   :  { %2240 = vrcp.f32 %v607_v31 }
 0xc28   :  { %v2241_v32 = vpop.eup %2240 }
 0xc29   :  { %v611_v35 = vmul.f32 %v2241_v32, %v519_v20 }
 0xc89   :  { %v614_v33 = vpop.permute.xlu1 %613 }
 0xc8a   :  { %v616_v34 = vmul.f32 %v2241_v32, %v614_v33 }
 0xc8c   :  { %618 = vrot.lane.b32.xlu0 %v616_v34, %s2338_s4 }
 0xcfe   :  { %v619_v36 = vpop.permute.xlu0 %618 }
 0xcff   :  { %v621_v37 = vadd.f32 %v619_v36, %v611_v35 }
 0xd01   :  { %2242 = vtanh.f32 %v621_v37 }
 0xd0e   :  { %v2243_v38 = vpop.eup %2242 }
 0xd0f   :  { %624 = vrot.lane.b32.xlu1 %v2243_v38, %s2337_s14 }
 0xd81   :  { %v625_v39 = vpop.permute.xlu1 %624 }
 0xd82   :  { %v627_v40 = vmul.f32 %v2241_v32, %v625_v39 }
 0xd84   :  { %629 = vrot.lane.b32.xlu0 %v627_v40, %s2338_s4 }
 0xdf6   :  { %v630_v41 = vpop.permute.xlu0 %629 }
 0xdf7   :  { %632 = vst.msk [vmem:[#allocation2 + $0x8] sm:$0x3] %vm223_vm2, %v630_v41  ;;  %2072 = vmatmul.mubr.msk.f32.vlgmr.msra.gmra.mxu0 %vm120_vm3, %v630_v41 }
 0xdf8   :  { %2086 = vmatpush3.msra.mxu0 %v2386_v3  ;;  %2093 = vmatprep.mubr.msk.f32.mxu0 %vm2336_vm0, %v2335_v2 }
 0xdf9   :  { %2087 = vmatprep.subr.mxu0 %v2335_v2 }
 0xdfa   :  { %2088 = vmatpush3.msra.mxu0 %v2391_v4 }
 0xdfb   :  { %2089 = vmatprep.subr.mxu0 %v2335_v2 }
 0xdfc   :  { %2090 = vmatpush3.msra.mxu0 %v2401_v6 }
 0xdfd   :  { %2091 = vmatprep.subr.mxu0 %v2335_v2 }
 0xdfe   :  { %2092 = vmatpush3.msra.mxu0 %v2411_v7 }
 0xdff   :  { %2107 = vmatprep.subr.mxu0 %v2335_v2 }
 0xeb7   :  { %v701_v42 = vpop.f32.mrf.mxu0 }
 0xeb8   :  { %v705_v43 = vadd.f32 %v701_v42, %v2448_v15 }
 0xeb9   :  { %v2073_v44 = vpop.f32.mrf.mxu0 }
 0xeba   :  { %2244 = vtanh.f32 %v705_v43  ;;  %v1887_v46 = vmul.f32 -1.442695, %v705_v43 }
 0xebc   :  { %2246 = vpow2.f32 %v1887_v46 }
 0xec7   :  { %v2245_v45 = vpop.eup %2244 }
 0xec8   :  { %715 = vrot.lane.b32.xlu1 %v2245_v45, %s2337_s14 }
 0xec9   :  { %v2247_v47 = vpop.eup %2246 }
 0xeca   :  { %v709_v48 = vadd.f32 1.0, %v2247_v47 }
 0xecc   :  { %2248 = vrcp.f32 %v709_v48 }
 0xed9   :  { %v2249_v49 = vpop.eup %2248 }
 0xeda   :  { %v713_v52 = vmul.f32 %v2249_v49, %v621_v37 }
 0xf3a   :  { %v716_v50 = vpop.permute.xlu1 %715 }
 0xf3b   :  { %v718_v51 = vmul.f32 %v2249_v49, %v716_v50 }
 0xf3d   :  { %720 = vrot.lane.b32.xlu0 %v718_v51, %s2338_s4 }
 0xfaf   :  { %v721_v53 = vpop.permute.xlu0 %720 }
 0xfb0   :  { %v723_v54 = vadd.f32 %v721_v53, %v713_v52 }
 0xfb2   :  { %2250 = vtanh.f32 %v723_v54 }
 0xfbf   :  { %v2251_v55 = vpop.eup %2250 }
 0xfc0   :  { %726 = vrot.lane.b32.xlu1 %v2251_v55, %s2337_s14 }
0x1032   :  { %v727_v56 = vpop.permute.xlu1 %726 }
0x1033   :  { %v729_v57 = vmul.f32 %v2249_v49, %v727_v56 }
0x1035   :  { %731 = vrot.lane.b32.xlu0 %v729_v57, %s2338_s4 }
0x10a7   :  { %v732_v58 = vpop.permute.xlu0 %731 }
0x10a8   :  { %734 = vst.msk [vmem:[#allocation2 + $0xa] sm:$0x3] %vm223_vm2, %v732_v58  ;;  %2083 = vmatmul.mubr.msk.f32.vlgmr.msra.gmra.mxu1 %vm120_vm3, %v732_v58 }
0x10a9   :  { %2097 = vmatpush3.msra.mxu1 %v2386_v3  ;;  %2104 = vmatprep.mubr.msk.f32.mxu1 %vm2336_vm0, %v2335_v2 }
0x10aa   :  { %2098 = vmatprep.subr.mxu1 %v2335_v2 }
0x10ab   :  { %2099 = vmatpush3.msra.mxu1 %v2391_v4 }
0x10ac   :  { %2100 = vmatprep.subr.mxu1 %v2335_v2 }
0x10ad   :  { %2101 = vmatpush3.msra.mxu1 %v2401_v6 }
0x10ae   :  { %2102 = vmatprep.subr.mxu1 %v2335_v2 }
0x10af   :  { %2103 = vmatpush3.msra.mxu1 %v2411_v7 }
0x10b0   :  { %2118 = vmatprep.subr.mxu1 %v2335_v2 }
0x1168   :  { %v803_v59 = vpop.f32.mrf.mxu1 }
0x1169   :  { %v807_v60 = vadd.f32 %v803_v59, %v2448_v15 }
0x116a   :  { %v2084_v61 = vpop.f32.mrf.mxu1 }
0x116b   :  { %2252 = vtanh.f32 %v807_v60  ;;  %v1889_v63 = vmul.f32 -1.442695, %v807_v60 }
0x116d   :  { %2254 = vpow2.f32 %v1889_v63 }
0x1178   :  { %v2253_v62 = vpop.eup %2252 }
0x1179   :  { %817 = vrot.lane.b32.xlu1 %v2253_v62, %s2337_s14 }
0x117a   :  { %v2255_v0 = vpop.eup %2254 }
0x117b   :  { %v811_v1 = vadd.f32 1.0, %v2255_v0 }
0x117d   :  { %2256 = vrcp.f32 %v811_v1 }
0x118a   :  { %v2257_v5 = vpop.eup %2256 }
0x118b   :  { %v815_v10 = vmul.f32 %v2257_v5, %v723_v54 }
0x11eb   :  { %v818_v8 = vpop.permute.xlu1 %817 }
0x11ec   :  { %v820_v9 = vmul.f32 %v2257_v5, %v818_v8 }
0x11ee   :  { %822 = vrot.lane.b32.xlu0 %v820_v9, %s2338_s4 }
0x1260   :  { %v823_v11 = vpop.permute.xlu0 %822 }
0x1261   :  { %v825_v12 = vadd.f32 %v823_v11, %v815_v10 }
0x1263   :  { %2258 = vtanh.f32 %v825_v12 }
0x1270   :  { %v2259_v13 = vpop.eup %2258 }
0x1271   :  { %828 = vrot.lane.b32.xlu1 %v2259_v13, %s2337_s14 }
0x12e3   :  { %v829_v14 = vpop.permute.xlu1 %828 }
0x12e4   :  { %v831_v16 = vmul.f32 %v2257_v5, %v829_v14 }
0x12e6   :  { %833 = vrot.lane.b32.xlu0 %v831_v16, %s2338_s4 }
0x1358   :  { %v834_v17 = vpop.permute.xlu0 %833 }
0x1359   :  { %836 = vst.msk [vmem:[#allocation2 + $0xc] sm:$0x3] %vm223_vm2, %v834_v17  ;;  %2094 = vmatmul.mubr.msk.f32.vlgmr.msra.gmra.mxu0 %vm120_vm3, %v834_v17 }
0x135a   :  { %2108 = vmatpush3.msra.mxu0 %v2386_v3  ;;  %2115 = vmatprep.mubr.msk.f32.mxu0 %vm2336_vm0, %v2335_v2 }
0x135b   :  { %2109 = vmatprep.subr.mxu0 %v2335_v2 }
0x135c   :  { %2110 = vmatpush3.msra.mxu0 %v2391_v4 }
0x135d   :  { %2111 = vmatprep.subr.mxu0 %v2335_v2 }
0x135e   :  { %2112 = vmatpush3.msra.mxu0 %v2401_v6 }
0x135f   :  { %2113 = vmatprep.subr.mxu0 %v2335_v2 }
0x1360   :  { %2114 = vmatpush3.msra.mxu0 %v2411_v7 }
0x1361   :  { %2129 = vmatprep.subr.mxu0 %v2335_v2 }
0x1419   :  { %v905_v18 = vpop.f32.mrf.mxu0 }
0x141a   :  { %v909_v19 = vadd.f32 %v905_v18, %v2448_v15 }
0x141b   :  { %v2095_v20 = vpop.f32.mrf.mxu0 }
0x141c   :  { %2260 = vtanh.f32 %v909_v19  ;;  %v1891_v22 = vmul.f32 -1.442695, %v909_v19 }
0x141e   :  { %2262 = vpow2.f32 %v1891_v22 }
0x1429   :  { %v2261_v21 = vpop.eup %2260 }
0x142a   :  { %919 = vrot.lane.b32.xlu1 %v2261_v21, %s2337_s14 }
0x142b   :  { %v2263_v23 = vpop.eup %2262 }
0x142c   :  { %v913_v24 = vadd.f32 1.0, %v2263_v23 }
0x142e   :  { %2264 = vrcp.f32 %v913_v24 }
0x143b   :  { %v2265_v25 = vpop.eup %2264 }
0x143c   :  { %v917_v28 = vmul.f32 %v2265_v25, %v825_v12 }
0x149c   :  { %v920_v26 = vpop.permute.xlu1 %919 }
0x149d   :  { %v922_v27 = vmul.f32 %v2265_v25, %v920_v26 }
0x149f   :  { %924 = vrot.lane.b32.xlu0 %v922_v27, %s2338_s4 }
0x1511   :  { %v925_v29 = vpop.permute.xlu0 %924 }
0x1512   :  { %v927_v30 = vadd.f32 %v925_v29, %v917_v28 }
0x1514   :  { %2266 = vtanh.f32 %v927_v30 }
0x1521   :  { %v2267_v31 = vpop.eup %2266 }
0x1522   :  { %930 = vrot.lane.b32.xlu1 %v2267_v31, %s2337_s14 }
0x1594   :  { %v931_v32 = vpop.permute.xlu1 %930 }
0x1595   :  { %v933_v33 = vmul.f32 %v2265_v25, %v931_v32 }
0x1597   :  { %935 = vrot.lane.b32.xlu0 %v933_v33, %s2338_s4 }
0x1609   :  { %v936_v34 = vpop.permute.xlu0 %935 }
0x160a   :  { %938 = vst.msk [vmem:[#allocation2 + $0xe] sm:$0x3] %vm223_vm2, %v936_v34  ;;  %2105 = vmatmul.mubr.msk.f32.vlgmr.msra.gmra.mxu1 %vm120_vm3, %v936_v34 }
0x160b   :  { %2119 = vmatpush3.msra.mxu1 %v2386_v3  ;;  %2126 = vmatprep.mubr.msk.f32.mxu1 %vm2336_vm0, %v2335_v2 }
0x160c   :  { %2120 = vmatprep.subr.mxu1 %v2335_v2 }
0x160d   :  { %2121 = vmatpush3.msra.mxu1 %v2391_v4 }
0x160e   :  { %2122 = vmatprep.subr.mxu1 %v2335_v2 }
0x160f   :  { %2123 = vmatpush3.msra.mxu1 %v2401_v6 }
0x1610   :  { %2124 = vmatprep.subr.mxu1 %v2335_v2 }
0x1611   :  { %2125 = vmatpush3.msra.mxu1 %v2411_v7 }
0x1612   :  { %2140 = vmatprep.subr.mxu1 %v2335_v2 }
0x16ca   :  { %v1007_v35 = vpop.f32.mrf.mxu1 }
0x16cb   :  { %v1011_v36 = vadd.f32 %v1007_v35, %v2448_v15 }
0x16cc   :  { %v2106_v37 = vpop.f32.mrf.mxu1 }
0x16cd   :  { %2268 = vtanh.f32 %v1011_v36  ;;  %v1893_v39 = vmul.f32 -1.442695, %v1011_v36 }
0x16cf   :  { %2270 = vpow2.f32 %v1893_v39 }
0x16da   :  { %v2269_v38 = vpop.eup %2268 }
0x16db   :  { %1021 = vrot.lane.b32.xlu1 %v2269_v38, %s2337_s14 }
0x16dc   :  { %v2271_v40 = vpop.eup %2270 }
0x16dd   :  { %v1015_v41 = vadd.f32 1.0, %v2271_v40 }
0x16df   :  { %2272 = vrcp.f32 %v1015_v41 }
0x16ec   :  { %v2273_v42 = vpop.eup %2272 }
0x16ed   :  { %v1019_v45 = vmul.f32 %v2273_v42, %v927_v30 }
0x174d   :  { %v1022_v43 = vpop.permute.xlu1 %1021 }
0x174e   :  { %v1024_v44 = vmul.f32 %v2273_v42, %v1022_v43 }
0x1750   :  { %1026 = vrot.lane.b32.xlu0 %v1024_v44, %s2338_s4 }
0x17c2   :  { %v1027_v46 = vpop.permute.xlu0 %1026 }
0x17c3   :  { %v1029_v47 = vadd.f32 %v1027_v46, %v1019_v45 }
0x17c5   :  { %2274 = vtanh.f32 %v1029_v47 }
0x17d2   :  { %v2275_v48 = vpop.eup %2274 }
0x17d3   :  { %1032 = vrot.lane.b32.xlu1 %v2275_v48, %s2337_s14 }
0x1845   :  { %v1033_v49 = vpop.permute.xlu1 %1032 }
0x1846   :  { %v1035_v50 = vmul.f32 %v2273_v42, %v1033_v49 }
0x1848   :  { %1037 = vrot.lane.b32.xlu0 %v1035_v50, %s2338_s4 }
0x18ba   :  { %v1038_v51 = vpop.permute.xlu0 %1037 }
0x18bb   :  { %1040 = vst.msk [vmem:[#allocation2 + $0x10] sm:$0x3] %vm223_vm2, %v1038_v51  ;;  %2116 = vmatmul.mubr.msk.f32.vlgmr.msra.gmra.mxu0 %vm120_vm3, %v1038_v51 }
0x18bc   :  { %2130 = vmatpush3.msra.mxu0 %v2386_v3  ;;  %2137 = vmatprep.mubr.msk.f32.mxu0 %vm2336_vm0, %v2335_v2 }
0x18bd   :  { %2131 = vmatprep.subr.mxu0 %v2335_v2 }
0x18be   :  { %2132 = vmatpush3.msra.mxu0 %v2391_v4 }
0x18bf   :  { %2133 = vmatprep.subr.mxu0 %v2335_v2 }
0x18c0   :  { %2134 = vmatpush3.msra.mxu0 %v2401_v6 }
0x18c1   :  { %2135 = vmatprep.subr.mxu0 %v2335_v2 }
0x18c2   :  { %2136 = vmatpush3.msra.mxu0 %v2411_v7 }
0x18c3   :  { %2151 = vmatprep.subr.mxu0 %v2335_v2 }
0x197b   :  { %v1109_v52 = vpop.f32.mrf.mxu0 }
0x197c   :  { %v1113_v53 = vadd.f32 %v1109_v52, %v2448_v15 }
0x197d   :  { %v2117_v54 = vpop.f32.mrf.mxu0 }
0x197e   :  { %2276 = vtanh.f32 %v1113_v53  ;;  %v1895_v56 = vmul.f32 -1.442695, %v1113_v53 }
0x1980   :  { %2278 = vpow2.f32 %v1895_v56 }
0x198b   :  { %v2277_v55 = vpop.eup %2276 }
0x198c   :  { %1123 = vrot.lane.b32.xlu1 %v2277_v55, %s2337_s14 }
0x198d   :  { %v2279_v57 = vpop.eup %2278 }
0x198e   :  { %v1117_v58 = vadd.f32 1.0, %v2279_v57 }
0x1990   :  { %2280 = vrcp.f32 %v1117_v58 }
0x199d   :  { %v2281_v59 = vpop.eup %2280 }
0x199e   :  { %v1121_v62 = vmul.f32 %v2281_v59, %v1029_v47 }
0x19fe   :  { %v1124_v60 = vpop.permute.xlu1 %1123 }
0x19ff   :  { %v1126_v61 = vmul.f32 %v2281_v59, %v1124_v60  ;;  %v2332_v60 = vld [vmem:[%s2735_s3 + $0x18] sm:$0xff] }
0x1a01   :  { %1128 = vrot.lane.b32.xlu0 %v1126_v61, %s2338_s4  ;;  %v2333_v61 = vld [vmem:[%s2735_s3 + $0x10] sm:$0xff] }
0x1a73   :  { %v1129_v63 = vpop.permute.xlu0 %1128 }
0x1a74   :  { %v1131_v0 = vadd.f32 %v1129_v63, %v1121_v62 }
0x1a76   :  { %2282 = vtanh.f32 %v1131_v0 }
0x1a83   :  { %v2283_v1 = vpop.eup %2282 }
0x1a84   :  { %1134 = vrot.lane.b32.xlu1 %v2283_v1, %s2337_s14 }
0x1af6   :  { %v1135_v5 = vpop.permute.xlu1 %1134 }
0x1af7   :  { %v1137_v8 = vmul.f32 %v2281_v59, %v1135_v5 }
0x1af9   :  { %1139 = vrot.lane.b32.xlu0 %v1137_v8, %s2338_s4 }
0x1b6b   :  { %v1140_v9 = vpop.permute.xlu0 %1139 }
0x1b6c   :  { %1142 = vst.msk [vmem:[#allocation2 + $0x12] sm:$0x3] %vm223_vm2, %v1140_v9  ;;  %2127 = vmatmul.mubr.msk.f32.vlgmr.msra.gmra.mxu1 %vm120_vm3, %v1140_v9 }
0x1b6d   :  { %2141 = vmatpush3.msra.mxu1 %v2386_v3  ;;  %2148 = vmatprep.mubr.msk.f32.mxu1 %vm2336_vm0, %v2335_v2 }
0x1b6e   :  { %2142 = vmatprep.subr.mxu1 %v2335_v2 }
0x1b6f   :  { %2143 = vmatpush3.msra.mxu1 %v2391_v4 }
0x1b70   :  { %2144 = vmatprep.subr.mxu1 %v2335_v2 }
0x1b71   :  { %2145 = vmatpush3.msra.mxu1 %v2401_v6 }
0x1b72   :  { %2146 = vmatprep.subr.mxu1 %v2335_v2 }
0x1b73   :  { %2147 = vmatpush3.msra.mxu1 %v2411_v7 }
0x1b74   :  { %2162 = vmatprep.subr.mxu1 %v2335_v2 }
0x1c2c   :  { %v1211_v10 = vpop.f32.mrf.mxu1 }
0x1c2d   :  { %v1215_v11 = vadd.f32 %v1211_v10, %v2448_v15 }
0x1c2e   :  { %v2128_v12 = vpop.f32.mrf.mxu1 }
0x1c2f   :  { %2284 = vtanh.f32 %v1215_v11  ;;  %v1897_v14 = vmul.f32 -1.442695, %v1215_v11 }
0x1c31   :  { %2286 = vpow2.f32 %v1897_v14 }
0x1c3c   :  { %v2285_v13 = vpop.eup %2284 }
0x1c3d   :  { %1225 = vrot.lane.b32.xlu1 %v2285_v13, %s2337_s14  ;;  %v1762_v13 = vld [vmem:[%s2739_s5 + $0x18] sm:$0xff] }
0x1c3e   :  { %v2287_v16 = vpop.eup %2286 }
0x1c3f   :  { %v1219_v17 = vadd.f32 1.0, %v2287_v16 }
0x1c41   :  { %2288 = vrcp.f32 %v1219_v17 }
0x1c4e   :  { %v2289_v18 = vpop.eup %2288 }
0x1c4f   :  { %v1223_v21 = vmul.f32 %v2289_v18, %v1131_v0 }
0x1caf   :  { %v1226_v19 = vpop.permute.xlu1 %1225 }
0x1cb0   :  { %v1228_v20 = vmul.f32 %v2289_v18, %v1226_v19  ;;  %v1761_v19 = vld [vmem:[%s2739_s5 + $0x10] sm:$0xff] }
0x1cb2   :  { %1230 = vrot.lane.b32.xlu0 %v1228_v20, %s2338_s4  ;;  %v1755_v20 = vld [vmem:[#allocation2] sm:$0xff] }
0x1d24   :  { %v1231_v22 = vpop.permute.xlu0 %1230 }
0x1d25   :  { %v1233_v23 = vadd.f32 %v1231_v22, %v1223_v21  ;;  %v1760_v21 = vld [vmem:[%s2739_s5 + $0x8] sm:$0xff]  ;;  %v1759_v22 = vld [vmem:[%s2739_s5] sm:$0xff] }
0x1d27   :  { %2290 = vtanh.f32 %v1233_v23 }
0x1d34   :  { %v2291_v24 = vpop.eup %2290 }
0x1d35   :  { %1236 = vrot.lane.b32.xlu1 %v2291_v24, %s2337_s14 }
0x1da7   :  { %v1237_v25 = vpop.permute.xlu1 %1236 }
0x1da8   :  { %v1239_v26 = vmul.f32 %v2289_v18, %v1237_v25 }
0x1daa   :  { %1241 = vrot.lane.b32.xlu0 %v1239_v26, %s2338_s4 }
0x1e1c   :  { %v1242_v27 = vpop.permute.xlu0 %1241 }
0x1e1d   :  { %1244 = vst.msk [vmem:[#allocation2 + $0x14] sm:$0x3] %vm223_vm2, %v1242_v27  ;;  %2138 = vmatmul.mubr.msk.f32.vlgmr.msra.gmra.mxu0 %vm120_vm3, %v1242_v27 }
0x1e1e   :  { %2152 = vmatpush3.msra.mxu0 %v2386_v3  ;;  %2159 = vmatprep.mubr.msk.f32.mxu0 %vm2336_vm0, %v2335_v2 }
0x1e1f   :  { %2153 = vmatprep.subr.mxu0 %v2335_v2 }
0x1e20   :  { %2154 = vmatpush3.msra.mxu0 %v2391_v4 }
0x1e21   :  { %2155 = vmatprep.subr.mxu0 %v2335_v2 }
0x1e22   :  { %2156 = vmatpush3.msra.mxu0 %v2401_v6 }
0x1e23   :  { %2157 = vmatprep.subr.mxu0 %v2335_v2 }
0x1e24   :  { %2158 = vmatpush3.msra.mxu0 %v2411_v7 }
0x1e25   :  { %2173 = vmatprep.subr.mxu0 %v2335_v2 }
0x1edd   :  { %v1313_v28 = vpop.f32.mrf.mxu0 }
0x1ede   :  { %v1317_v29 = vadd.f32 %v1313_v28, %v2448_v15  ;;  %v2699_v28 = vld [vmem:[%s2740_s6] ss:$0 sm:$0xff] }
0x1edf   :  { %v2139_v30 = vpop.f32.mrf.mxu0 }
0x1ee0   :  { %2292 = vtanh.f32 %v1317_v29  ;;  %v1899_v32 = vmul.f32 -1.442695, %v1317_v29 }
0x1ee2   :  { %2294 = vpow2.f32 %v1899_v32 }
0x1eed   :  { %v2293_v31 = vpop.eup %2292 }
0x1eee   :  { %1327 = vrot.lane.b32.xlu1 %v2293_v31, %s2337_s14 }
0x1eef   :  { %v2295_v33 = vpop.eup %2294 }
0x1ef0   :  { %v1321_v34 = vadd.f32 1.0, %v2295_v33 }
0x1ef2   :  { %2296 = vrcp.f32 %v1321_v34 }
0x1eff   :  { %v2297_v35 = vpop.eup %2296 }
0x1f00   :  { %v1325_v38 = vmul.f32 %v2297_v35, %v1233_v23  ;;  %v1756_v23 = vld [vmem:[#allocation2 + $0x8] sm:$0xff] }
0x1f60   :  { %v1328_v36 = vpop.permute.xlu1 %1327 }
0x1f61   :  { %v1330_v37 = vmul.f32 %v2297_v35, %v1328_v36 }
0x1f63   :  { %1332 = vrot.lane.b32.xlu0 %v1330_v37, %s2338_s4 }
0x1fd5   :  { %v1333_v39 = vpop.permute.xlu0 %1332 }
0x1fd6   :  { %v1335_v40 = vadd.f32 %v1333_v39, %v1325_v38 }
0x1fd8   :  { %2298 = vtanh.f32 %v1335_v40 }
0x1fe5   :  { %v2299_v41 = vpop.eup %2298 }
0x1fe6   :  { %1338 = vrot.lane.b32.xlu1 %v2299_v41, %s2337_s14 }
0x2058   :  { %v1339_v42 = vpop.permute.xlu1 %1338 }
0x2059   :  { %v1341_v43 = vmul.f32 %v2297_v35, %v1339_v42 }
0x205b   :  { %1343 = vrot.lane.b32.xlu0 %v1341_v43, %s2338_s4 }
0x20cd   :  { %v1344_v44 = vpop.permute.xlu0 %1343 }
0x20ce   :  { %1346 = vst.msk [vmem:[#allocation2 + $0x16] sm:$0x3] %vm223_vm2, %v1344_v44  ;;  %2149 = vmatmul.mubr.msk.f32.vlgmr.msra.gmra.mxu1 %vm120_vm3, %v1344_v44 }
0x20cf   :  { %2163 = vmatpush3.msra.mxu1 %v2386_v3  ;;  %2170 = vmatprep.mubr.msk.f32.mxu1 %vm2336_vm0, %v2335_v2 }
0x20d0   :  { %2164 = vmatprep.subr.mxu1 %v2335_v2 }
0x20d1   :  { %2165 = vmatpush3.msra.mxu1 %v2391_v4 }
0x20d2   :  { %2166 = vmatprep.subr.mxu1 %v2335_v2 }
0x20d3   :  { %2167 = vmatpush3.msra.mxu1 %v2401_v6 }
0x20d4   :  { %2168 = vmatprep.subr.mxu1 %v2335_v2 }
0x20d5   :  { %2169 = vmatpush3.msra.mxu1 %v2411_v7  ;;  %v1757_v24 = vld [vmem:[#allocation2 + $0x10] sm:$0xff] }
0x20d6   :  { %2184 = vmatprep.subr.mxu1 %v1762_v13 }
0x218e   :  { %v1415_v45 = vpop.f32.mrf.mxu1 }
0x218f   :  { %v1419_v46 = vadd.f32 %v1415_v45, %v2448_v15 }
0x2190   :  { %v2150_v47 = vpop.f32.mrf.mxu1 }
0x2191   :  { %2300 = vtanh.f32 %v1419_v46  ;;  %v1901_v48 = vmul.f32 -1.442695, %v1419_v46 }
0x2193   :  { %2302 = vpow2.f32 %v1901_v48 }
0x219e   :  { %v2301_v3 = vpop.eup %2300 }
0x219f   :  { %1429 = vrot.lane.b32.xlu1 %v2301_v3, %s2337_s14 }
0x21a0   :  { %v2303_v49 = vpop.eup %2302 }
0x21a1   :  { %v1423_v4 = vadd.f32 1.0, %v2303_v49 }
0x21a3   :  { %2304 = vrcp.f32 %v1423_v4 }
0x21b0   :  { %v2305_v50 = vpop.eup %2304 }
0x21b1   :  { %v1427_v53 = vmul.f32 %v2305_v50, %v1335_v40 }
0x2211   :  { %v1430_v51 = vpop.permute.xlu1 %1429 }
0x2212   :  { %v1432_v52 = vmul.f32 %v2305_v50, %v1430_v51 }
0x2214   :  { %1434 = vrot.lane.b32.xlu0 %v1432_v52, %s2338_s4 }
0x2286   :  { %v1435_v54 = vpop.permute.xlu0 %1434 }
0x2287   :  { %v1437_v55 = vadd.f32 %v1435_v54, %v1427_v53 }
0x2289   :  { %2306 = vtanh.f32 %v1437_v55 }
0x2296   :  { %v2307_v56 = vpop.eup %2306 }
0x2297   :  { %1440 = vrot.lane.b32.xlu1 %v2307_v56, %s2337_s14 }
0x2309   :  { %v1441_v57 = vpop.permute.xlu1 %1440 }
0x230a   :  { %v1443_v58 = vmul.f32 %v2305_v50, %v1441_v57 }
0x230c   :  { %1445 = vrot.lane.b32.xlu0 %v1443_v58, %s2338_s4 }
0x237e   :  { %v1446_v59 = vpop.permute.xlu0 %1445 }
0x237f   :  { %1448 = vst.msk [vmem:[#allocation2 + $0x18] sm:$0x3] %vm223_vm2, %v1446_v59  ;;  %2160 = vmatmul.mubr.msk.f32.vlgmr.msra.gmra.mxu0 %vm120_vm3, %v1446_v59 }
0x2380   :  { %2174 = vmatpush3.msra.mxu0 %v2332_v60  ;;  %2181 = vmatprep.mubr.msk.f32.mxu0 %vm2336_vm0, %v2335_v2 }
0x2381   :  { %2175 = vmatprep.subr.mxu0 %v2335_v2 }
0x2382   :  { %2176 = vmatpush3.msra.mxu0 %v2333_v61 }
0x2383   :  { %2177 = vmatprep.subr.mxu0 %v2335_v2 }
0x2384   :  { %2178 = vmatpush3.msra.mxu0 %v2401_v6 }
0x2385   :  { %2179 = vmatprep.subr.mxu0 %v2335_v2 }
0x2386   :  { %2180 = vmatpush3.msra.mxu0 %v2411_v7 }
0x243f   :  { %v1517_v62 = vpop.f32.mrf.mxu0 }
0x2440   :  { %v1521_v63 = vadd.f32 %v1517_v62, %v2448_v15 }
0x2441   :  { %v2161_v0 = vpop.f32.mrf.mxu0 }
0x2442   :  { %2308 = vtanh.f32 %v1521_v63  ;;  %v1903_v5 = vmul.f32 -1.442695, %v1521_v63 }
0x2444   :  { %2310 = vpow2.f32 %v1903_v5 }
0x244f   :  { %v2309_v1 = vpop.eup %2308 }
0x2450   :  { %1531 = vrot.lane.b32.xlu1 %v2309_v1, %s2337_s14 }
0x2451   :  { %v2311_v8 = vpop.eup %2310 }
0x2452   :  { %v1525_v9 = vadd.f32 1.0, %v2311_v8 }
0x2454   :  { %2312 = vrcp.f32 %v1525_v9 }
0x2461   :  { %v2313_v10 = vpop.eup %2312 }
0x2462   :  { %v1529_v2 = vmul.f32 %v2313_v10, %v1437_v55 }
0x24c2   :  { %v1532_v11 = vpop.permute.xlu1 %1531 }
0x24c3   :  { %v1534_v6 = vmul.f32 %v2313_v10, %v1532_v11 }
0x24c5   :  { %1536 = vrot.lane.b32.xlu0 %v1534_v6, %s2338_s4 }
0x2537   :  { %v1537_v7 = vpop.permute.xlu0 %1536 }
0x2538   :  { %v1539_v12 = vadd.f32 %v1537_v7, %v1529_v2 }
0x253a   :  { %2314 = vtanh.f32 %v1539_v12 }
0x2547   :  { %v2315_v14 = vpop.eup %2314 }
0x2548   :  { %1542 = vrot.lane.b32.xlu1 %v2315_v14, %s2337_s14 }
0x25ba   :  { %v1543_v16 = vpop.permute.xlu1 %1542 }
0x25bb   :  { %v1545_v17 = vmul.f32 %v2313_v10, %v1543_v16 }
0x25bd   :  { %1547 = vrot.lane.b32.xlu0 %v1545_v17, %s2338_s4 }
0x262f   :  { %v1548_v18 = vpop.permute.xlu0 %1547 }
0x2630   :  { %1550 = vst.msk [vmem:[#allocation2 + $0x1a] sm:$0x3] %vm223_vm2, %v1548_v18  ;;  %2171 = vmatmul.mubr.msk.f32.vlgmr.msra.gmra.mxu1 %vm120_vm3, %v1548_v18 }
0x2631   :  { %2185 = vmatpush3.msra.mxu1 %v1762_v13  ;;  %2192 = vmatprep.mubr.msk.f32.mxu1 %vm120_vm3, %v1755_v20 }
0x2632   :  { %2186 = vmatprep.subr.mxu1 %v1761_v19 }
0x2633   :  { %2187 = vmatpush3.msra.mxu1 %v1761_v19 }
0x2634   :  { %2188 = vmatprep.subr.mxu1 %v1760_v21 }
0x2635   :  { %2189 = vmatpush3.msra.mxu1 %v1760_v21 }
0x2636   :  { %2190 = vmatprep.subr.mxu1 %v1759_v22 }
0x2637   :  { %2191 = vmatpush3.msra.mxu1 %v1759_v22 }
0x2638   :  { %2193 = vmatmul.mubr.msk.f32.vlgmr.msra.gmra.mxu1 %vm120_vm3, %v1756_v23 }
0x2639   :  { %2195 = vmatprep.mubr.msk.f32.mxu1 %vm120_vm3, %v1757_v24 }
0x26f0   :  { %v1619_v25 = vpop.f32.mrf.mxu1 }
0x26f1   :  { %v1623_v26 = vadd.f32 %v1619_v25, %v2448_v15 }
0x26f2   :  { %v2172_v27 = vpop.f32.mrf.mxu1 }
0x26f3   :  { %2316 = vtanh.f32 %v1623_v26  ;;  %v1905_v34 = vmul.f32 -1.442695, %v1623_v26 }
0x26f5   :  { %2318 = vpow2.f32 %v1905_v34 }
0x26f8   :  { %v2194_v29 = vpop.f32.mrf.mxu1 }
0x26f9   :  { %v1854_v30 = vadd.f32 %v2194_v29, %v2699_v28 }
0x26fa   :  { %v1848_v31 = vpop.f32.mrf.mxu1 }
0x26fb   :  { %1868 = vst.msk [vmem:[%s2741_s7 + $0x8] sm:$0xff] %vm42_vm1, %v1854_v30  ;;  %v1849_v32 = vadd.f32 %v2699_v28, %v1848_v31 }
0x26fd   :  { %1867 = vst.msk [vmem:[%s2741_s7] sm:$0xff] %vm42_vm1, %v1849_v32 }
0x2700   :  { %v2317_v33 = vpop.eup %2316 }
0x2701   :  { %1633 = vrot.lane.b32.xlu1 %v2317_v33, %s2337_s14 }
0x2702   :  { %v2319_v35 = vpop.eup %2318 }
0x2703   :  { %v1627_v36 = vadd.f32 1.0, %v2319_v35 }
0x2705   :  { %2320 = vrcp.f32 %v1627_v36 }
0x2712   :  { %v2321_v37 = vpop.eup %2320 }
0x2713   :  { %v1631_v40 = vmul.f32 %v2321_v37, %v1539_v12 }
0x2773   :  { %v1634_v38 = vpop.permute.xlu1 %1633 }
0x2774   :  { %v1636_v39 = vmul.f32 %v2321_v37, %v1634_v38 }
0x2776   :  { %1638 = vrot.lane.b32.xlu0 %v1636_v39, %s2338_s4 }
0x27e8   :  { %v1639_v41 = vpop.permute.xlu0 %1638 }
0x27e9   :  { %v1641_v42 = vadd.f32 %v1639_v41, %v1631_v40 }
0x27eb   :  { %2322 = vtanh.f32 %v1641_v42 }
0x27f8   :  { %v2323_v43 = vpop.eup %2322 }
0x27f9   :  { %1644 = vrot.lane.b32.xlu1 %v2323_v43, %s2337_s14 }
0x286b   :  { %v1645_v44 = vpop.permute.xlu1 %1644 }
0x286c   :  { %v1647_v45 = vmul.f32 %v2321_v37, %v1645_v44 }
0x286e   :  { %1649 = vrot.lane.b32.xlu0 %v1647_v45, %s2338_s4 }
0x28e0   :  { %v1650_v46 = vpop.permute.xlu0 %1649 }
0x28e1   :  { %1652 = vst.msk [vmem:[#allocation2 + $0x1c] sm:$0x3] %vm223_vm2, %v1650_v46  ;;  %2182 = vmatmul.mubr.msk.f32.vlgmr.msra.gmra.mxu0 %vm120_vm3, %v1650_v46 }
0x29a1   :  { %v1721_v47 = vpop.f32.mrf.mxu0 }
0x29a2   :  { %v1725_v3 = vadd.f32 %v1721_v47, %v2448_v15 }
0x29a3   :  { %v2183_v48 = vpop.f32.mrf.mxu0 }
0x29a4   :  { %2324 = vtanh.f32 %v1725_v3  ;;  %v1907_v4 = vmul.f32 -1.442695, %v1725_v3 }
0x29a6   :  { %2326 = vpow2.f32 %v1907_v4 }
0x29b1   :  { %v2325_v49 = vpop.eup %2324 }
0x29b2   :  { %1735 = vrot.lane.b32.xlu1 %v2325_v49, %s2337_s14 }
0x29b3   :  { %v2327_v50 = vpop.eup %2326 }
0x29b4   :  { %v1729_v51 = vadd.f32 1.0, %v2327_v50 }
0x29b6   :  { %2328 = vrcp.f32 %v1729_v51 }
0x29c3   :  { %v2329_v52 = vpop.eup %2328 }
0x29c4   :  { %v1733_v55 = vmul.f32 %v2329_v52, %v1641_v42 }
0x2a24   :  { %v1736_v53 = vpop.permute.xlu1 %1735 }
0x2a25   :  { %v1738_v54 = vmul.f32 %v2329_v52, %v1736_v53 }
0x2a27   :  { %1740 = vrot.lane.b32.xlu0 %v1738_v54, %s2338_s4 }
0x2a99   :  { %v1741_v56 = vpop.permute.xlu0 %1740 }
0x2a9a   :  { %v1743_v57 = vadd.f32 %v1741_v56, %v1733_v55 }
0x2a9c   :  { %2330 = vtanh.f32 %v1743_v57 }
0x2aa9   :  { %v2331_v15 = vpop.eup %2330 }
0x2aaa   :  { %1746 = vrot.lane.b32.xlu1 %v2331_v15, %s2337_s14 }
0x2b1c   :  { %v1747_v58 = vpop.permute.xlu1 %1746 }
0x2b1d   :  { %v1749_v59 = vmul.f32 %v2329_v52, %v1747_v58 }
0x2b1f   :  { %1751 = vrot.lane.b32.xlu0 %v1749_v59, %s2338_s4 }
0x2b91   :  { %v1752_v60 = vpop.permute.xlu0 %1751 }
0x2b92   :  { %1754 = vst.msk [vmem:[#allocation2 + $0x1e] sm:$0x3] %vm223_vm2, %v1752_v60 }
0x2b99   :  { %v1758_v61 = vld [vmem:[#allocation2 + $0x18] sm:$0xff] }
0x2b9a   :  { %2196 = vmatmul.mubr.msk.f32.gmra.mxu1 %vm120_vm3, %v1758_v61 }
0x2c5a   :  { %v2197_v62 = vpop.f32.mrf.mxu1 }
0x2c5b   :  { %v1864_v63 = vadd.f32 %v2197_v62, %v2699_v28 }
0x2c5c   :  { %v1858_v0 = vpop.f32.mrf.mxu1 }
0x2c5d   :  { %1870 = vst.msk [vmem:[%s2741_s7 + $0x18] sm:$0xff] %vm42_vm1, %v1864_v63  ;;  %v1859_v1 = vadd.f32 %v2699_v28, %v1858_v0 }
0x2c5f   :  { %1869 = vst.msk [vmem:[%s2741_s7 + $0x10] sm:$0xff] %vm42_vm1, %v1859_v1 }

</bundles_post_ra>
